<compile_context>
chip_gen: v6e
topology: v6e:2x2x1
jax: 0.10.0
libtpu: 0.0.40
codegen_flags: <defaults>
</compile_context>

<pallas_src>
import functools

import jax
import jax.numpy as jnp
from jax.experimental import pallas as pl
from jax.experimental.pallas import tpu as pltpu


# --------------------------------------------------------------------------- #
# Kernel
# --------------------------------------------------------------------------- #
def _obj_attention_kernel(proj_ref,   # VMEM (TB, IMG_DIM)       bf16
                          mask_ref,   # VMEM (TB, MAX_OBJECTS)   f32 (0 / -inf)
                          img_ref,    # VMEM (TB, O, IMG_DIM)    bf16
                          out_ref):   # VMEM (TB, IMG_DIM)       f32
    img = img_ref[...]                 # (TB, O, D)  bf16
    proj = proj_ref[...]               # (TB, D)     bf16
    mask = mask_ref[...]               # (TB, O)     f32 additive mask

    # --- attention logits on the VPU: broadcast-multiply + lane reduce -------
    # logits[b, o] = sum_d proj[b, d] * img[b, o, d]   (f32 accumulation)
    prod = proj[:, None, :] * img                              # (TB, O, D) bf16
    logits = jnp.sum(prod.astype(jnp.float32), axis=-1) + mask  # (TB, O) f32
    # NOTE: a row whose mask is all -inf (num_objects == 0) softmaxes to NaN,
    # exactly like the reference PyTorch forward.

    # --- lane-dense softmax over the object (last) axis ----------------------
    m = jnp.max(logits, axis=-1, keepdims=True)
    e = jnp.exp(logits - m)
    s = jnp.sum(e, axis=-1, keepdims=True)
    r = pl.reciprocal(s, approx=True)          # EUP slot, essentially free
    r = r * (2.0 - s * r)                      # one Newton step -> ~f32 accurate
    weights = (e * r).astype(img.dtype)        # (TB, O) bf16

    # --- weighted pooling on the MXU ------------------------------------------
    # RHS contracts its leading (K=O) dim -> natural [K, N] orientation, no
    # transposed copy of the img tile.  The q=1 dim only exists on register
    # values, never on a Ref, so no sublane-padded blocks / partial stores.
    pooled = jnp.einsum("bqk,bkd->bqd", weights[:, None, :], img,
                        preferred_element_type=jnp.float32)    # (TB, 1, D) f32
    out_ref[...] = jnp.squeeze(pooled, axis=1)                 # (TB, D) f32


# --------------------------------------------------------------------------- #
# VMEM / tile sizing helpers
# --------------------------------------------------------------------------- #
def _round_up(x, m):
    return (x + m - 1) // m * m


def _cdiv(a, b):
    return -(-a // b)


def _vmem_capacity_bytes():
    """Physical VMEM of the local chip (v5e/v6e: 128 MiB, v7x: 64 MiB)."""
    try:
        return int(pltpu.get_tpu_info().vmem_capacity_bytes)
    except Exception:  # pragma: no cover - conservative fallback (v7x size)
        return 64 * 2**20


def _step_vmem_bytes(tb, max_objects, img_dim):
    """Padded VMEM footprint of one grid step: double-buffered I/O blocks plus
    the in-kernel logits temporaries (bf16 product + its f32 upcast)."""
    d = _round_up(img_dim, 128)
    o_bf16 = _round_up(max_objects, 16)     # bf16 sublane packing
    o_f32 = _round_up(max_objects, 8)
    o_lane = _round_up(max_objects, 128)
    tb_bf16 = _round_up(tb, 16)
    tb_f32 = _round_up(tb, 8)

    img_blk = tb * o_bf16 * d * 2           # (tb, O, D) bf16  (dominant stream)
    proj_blk = tb_bf16 * d * 2              # (tb, D)    bf16
    mask_blk = tb_f32 * o_lane * 4          # (tb, O)    f32
    out_blk = tb_f32 * d * 4                # (tb, D)    f32
    pipelined = 2 * (img_blk + proj_blk + mask_blk + out_blk)   # double buffer

    temps = tb * o_bf16 * d * 2 + tb * o_f32 * d * 4            # prod + upcast
    return pipelined + temps


def _pick_block_batch(batch, max_objects, img_dim, budget_bytes):
    """Largest batch tile whose double-buffered, padding-aware footprint fits
    the budget.  Prefers a single step; otherwise an even step count (v7x has
    2 TensorCores sharing the 'parallel' grid axis)."""
    if _step_vmem_bytes(batch, max_objects, img_dim) <= budget_bytes:
        return batch                                    # single grid step
    per_row = _step_vmem_bytes(8, max_objects, img_dim) / 8.0
    tb = max(8, int(budget_bytes // per_row) // 8 * 8)
    while tb > 8 and _step_vmem_bytes(tb, max_objects, img_dim) > budget_bytes:
        tb -= 8
    tb = min(tb, _round_up(batch, 8))
    steps = _cdiv(batch, tb)
    if steps > 1 and steps % 2 == 1:                    # even split across TCs
        tb_even = max(8, _round_up(_cdiv(batch, steps + 1), 8))
        if _step_vmem_bytes(tb_even, max_objects, img_dim) <= budget_bytes:
            tb = tb_even
    return tb


def _vmem_limit_bytes(tb, max_objects, img_dim, vmem_capacity):
    """Scoped VMEM request: actual padded need + headroom for Mosaic internal
    scratch / relayout temporaries, capped at 80% of physical VMEM (keeps
    headroom on v7x's 64 MiB, uses most of v5e/v6e's 128 MiB)."""
    need = _step_vmem_bytes(tb, max_objects, img_dim)
    limit = int(need * 1.25) + (4 << 20)
    limit = max(limit, 16 << 20)
    return int(min(limit, int(vmem_capacity * 0.8)))


# --------------------------------------------------------------------------- #
# Wrapper
# --------------------------------------------------------------------------- #
def object_features_and_text(text_fts, img_fts, num_objects, w_t, bias,
                             *, block_batch=None):
    """Forward pass of ObjectFeaturesAndText.

    text_fts   : (B, QUEST_DIM)             float
    img_fts    : (B, MAX_OBJECTS, IMG_DIM)  float (streamed as bfloat16)
    num_objects: (B,)                       int   (rows with 0 -> NaN, as in torch)
    w_t        : (QUEST_DIM, IMG_DIM)       float (nn.Linear weight, transposed)
    bias       : (IMG_DIM,)                 float
    returns    : (B, IMG_DIM)               float32
    """
    batch, quest_dim = text_fts.shape
    b2, max_objects, img_dim = img_fts.shape
    assert b2 == batch
    assert w_t.shape == (quest_dim, img_dim)
    assert bias.shape == (img_dim,)

    vmem_cap = _vmem_capacity_bytes()
    tb = (_pick_block_batch(batch, max_objects, img_dim, int(vmem_cap * 0.7))
          if block_batch is None else block_batch)
    tb = min(tb, batch)

    # Linear projection: one full-batch MXU matmul done by XLA (keeps W and
    # bias out of the kernel's VMEM entirely).
    proj = (text_fts.astype(jnp.float32) @ w_t.astype(jnp.float32)
            + bias.astype(jnp.float32)[None, :])
    proj = proj.astype(jnp.bfloat16)                       # (B, D) bf16

    img_bf16 = img_fts.astype(jnp.bfloat16)                # (B, O, D) bf16

    # Additive -inf mask, layout-aligned with the (tb, O) logits block.
    obj_ids = jnp.arange(max_objects, dtype=jnp.int32)[None, :]
    valid = obj_ids < num_objects.astype(jnp.int32)[:, None]
    mask = jnp.where(valid, 0.0, -jnp.inf).astype(jnp.float32)   # (B, O) f32

    # Pad the batch to a multiple of tb so every grid step is dense.  Padded
    # rows are all-zero / all-valid -> finite garbage, sliced off afterwards.
    padded = _round_up(batch, tb)
    if padded != batch:
        pad = padded - batch
        proj = jnp.pad(proj, ((0, pad), (0, 0)))
        img_bf16 = jnp.pad(img_bf16, ((0, pad), (0, 0), (0, 0)))
        mask = jnp.pad(mask, ((0, pad), (0, 0)))

    grid = (padded // tb,)

    grid_spec = pltpu.PrefetchScalarGridSpec(
        num_scalar_prefetch=0,
        grid=grid,
        in_specs=[
            pl.BlockSpec((tb, img_dim), lambda i: (i, 0)),               # proj
            pl.BlockSpec((tb, max_objects), lambda i: (i, 0)),           # mask
            pl.BlockSpec((tb, max_objects, img_dim), lambda i: (i, 0, 0)),  # img
        ],
        out_specs=pl.BlockSpec((tb, img_dim), lambda i: (i, 0)),
    )

    cost = pl.CostEstimate(
        flops=4 * padded * max_objects * img_dim + 8 * padded * max_objects,
        transcendentals=padded * (max_objects + 1),
        bytes_accessed=(padded * max_objects * img_dim * 2   # img bf16
                        + padded * img_dim * 2                # proj bf16
                        + padded * max_objects * 4            # mask f32
                        + padded * img_dim * 4),               # out f32
    )

    out = pl.pallas_call(
        _obj_attention_kernel,
        out_shape=jax.ShapeDtypeStruct((padded, img_dim), jnp.float32),
        grid_spec=grid_spec,
        compiler_params=pltpu.CompilerParams(
            dimension_semantics=("parallel",),
            vmem_limit_bytes=_vmem_limit_bytes(tb, max_objects, img_dim,
                                               vmem_cap),
        ),
        cost_estimate=cost,
    )(proj, mask, img_bf16)
    return out[:batch]


# --------------------------------------------------------------------------- #
# Pure-JAX reference (mirrors the kernel's bf16 storage / product rounding)
# --------------------------------------------------------------------------- #
def _reference(text_fts, img_fts, num_objects, w_t, bias):
    max_objects = img_fts.shape[1]
    proj = (text_fts.astype(jnp.float32) @ w_t.astype(jnp.float32)
            + bias.astype(jnp.float32)[None, :]).astype(jnp.bfloat16)
    img = img_fts.astype(jnp.bfloat16)
    logits = jnp.sum((proj[:, None, :] * img).astype(jnp.float32), axis=2)
    m = jnp.arange(max_objects)[None, :] < num_objects[:, None]
    logits = jnp.where(m, logits, -jnp.inf)
    weights = jax.nn.softmax(logits, axis=1)
    weights = weights.astype(jnp.bfloat16).astype(jnp.float32)
    return jnp.sum(weights[:, :, None] * img.astype(jnp.float32), axis=1)


# --------------------------------------------------------------------------- #
if __name__ == "__main__":
    BATCH = 16
    QUEST_DIM = 32      # e.g. 768 for BERT, scaled down
    IMG_DIM = 128       # e.g. 2048 for R-CNN features, scaled down
    MAX_OBJECTS = 12

    key = jax.random.PRNGKey(0)
    k_text, k_img, k_w, k_b, k_n = jax.random.split(key, 5)

    text_fts = jax.random.normal(k_text, (BATCH, QUEST_DIM), dtype=jnp.float32)
    img_fts = jax.random.normal(k_img, (BATCH, MAX_OBJECTS, IMG_DIM),
                                dtype=jnp.float32)
    # num_objects >= 1 (num_objects == 0 gives NaN, same as the torch module).
    num_objects = jax.random.randint(k_n, (BATCH,), 1, MAX_OBJECTS + 1)
    num_objects = num_objects.astype(jnp.int32)

    # nn.Linear(QUEST_DIM, IMG_DIM): weight (IMG_DIM, QUEST_DIM), bias (IMG_DIM,)
    w = jax.random.normal(k_w, (IMG_DIM, QUEST_DIM), dtype=jnp.float32) * 0.05
    b = jax.random.normal(k_b, (IMG_DIM,), dtype=jnp.float32) * 0.05
    w_t = w.T                                                      # (Q, D)

    fwd = jax.jit(object_features_and_text)
    out = jax.block_until_ready(fwd(text_fts, img_fts, num_objects, w_t, b))

    assert out.shape == (BATCH, IMG_DIM)
    assert bool(jnp.all(jnp.isfinite(out)))

    ref = _reference(text_fts, img_fts, num_objects, w_t, b)
    err = float(jnp.max(jnp.abs(out - ref)))
    assert jnp.allclose(out, ref, atol=2e-2, rtol=2e-2), err

    # Ragged batch + forced tiling: exercises the padding / multi-step grid path.
    B2 = 13
    k_t2, k_i2, k_n2 = jax.random.split(jax.random.PRNGKey(1), 3)
    t2 = jax.random.normal(k_t2, (B2, QUEST_DIM), dtype=jnp.float32)
    i2 = jax.random.normal(k_i2, (B2, MAX_OBJECTS, IMG_DIM), dtype=jnp.float32)
    n2 = jax.random.randint(k_n2, (B2,), 1, MAX_OBJECTS + 1).astype(jnp.int32)
    fwd2 = jax.jit(functools.partial(object_features_and_text, block_batch=8))
    out2 = jax.block_until_ready(fwd2(t2, i2, n2, w_t, b))
    assert out2.shape == (B2, IMG_DIM)
    ref2 = _reference(t2, i2, n2, w_t, b)
    err2 = float(jnp.max(jnp.abs(out2 - ref2)))
    assert jnp.allclose(out2, ref2, atol=2e-2, rtol=2e-2), err2

    print("KERNEL_OK")
</pallas_src>

<mosaic_0001>
module attributes {stable_mosaic.version = 11 : i64} {
  func.func @_obj_attention_kernel(%arg0: i32, %arg1: memref<16x128xbf16, #tpu.memory_space<vmem>>, %arg2: memref<16x12xf32, #tpu.memory_space<vmem>>, %arg3: memref<16x12x128xbf16, #tpu.memory_space<vmem>>, %arg4: memref<16x128xf32, #tpu.memory_space<vmem>>) attributes {dimension_semantics = [#tpu.dimension_semantics<parallel>], iteration_bounds = array<i64: 1>, scalar_prefetch = 0 : i64, scratch_operands = 0 : i64, tpu.core_type = #tpu.core_type<tc>, window_params = [{transform_indices = @transform_0, window_bounds = array<i64: 16, 128>}, {transform_indices = @transform_1, window_bounds = array<i64: 16, 12>}, {transform_indices = @transform_2, window_bounds = array<i64: 16, 12, 128>}, {transform_indices = @transform_3, window_bounds = array<i64: 16, 128>}]} {
    %c0 = arith.constant 0 : index
    %c0_0 = arith.constant 0 : index
    %c0_1 = arith.constant 0 : index
    %0 = vector.load %arg3[%c0, %c0_0, %c0_1] : memref<16x12x128xbf16, #tpu.memory_space<vmem>>, vector<16x12x128xbf16>
    %c0_2 = arith.constant 0 : index
    %c0_3 = arith.constant 0 : index
    %1 = vector.load %arg1[%c0_2, %c0_3] : memref<16x128xbf16, #tpu.memory_space<vmem>>, vector<16x128xbf16>
    %c0_4 = arith.constant 0 : index
    %c0_5 = arith.constant 0 : index
    %2 = vector.load %arg2[%c0_4, %c0_5] : memref<16x12xf32, #tpu.memory_space<vmem>>, vector<16x12xf32>
    %3 = vector.shape_cast %1 : vector<16x128xbf16> to vector<16x1x128xbf16>
    %4 = vector.broadcast %3 : vector<16x1x128xbf16> to vector<16x12x128xbf16>
    %5 = arith.mulf %4, %0 : vector<16x12x128xbf16>
    %6 = arith.extf %5 : vector<16x12x128xbf16> to vector<16x12x128xf32>
    %cst = arith.constant dense<0.000000e+00> : vector<16x12xf32>
    %7 = vector.multi_reduction <add>, %6, %cst [2] : vector<16x12x128xf32> to vector<16x12xf32>
    %8 = arith.addf %7, %2 : vector<16x12xf32>
    %cst_6 = arith.constant dense<0xFF800000> : vector<16xf32>
    %9 = vector.multi_reduction <maximumf>, %8, %cst_6 [1] : vector<16x12xf32> to vector<16xf32>
    %10 = vector.shape_cast %9 : vector<16xf32> to vector<16x1xf32>
    %11 = vector.broadcast %10 : vector<16x1xf32> to vector<16x12xf32>
    %12 = arith.subf %8, %11 : vector<16x12xf32>
    %13 = math.exp %12 : vector<16x12xf32>
    %cst_7 = arith.constant dense<0.000000e+00> : vector<16xf32>
    %14 = vector.multi_reduction <add>, %13, %cst_7 [1] : vector<16x12xf32> to vector<16xf32>
    %15 = vector.shape_cast %14 : vector<16xf32> to vector<16x1xf32>
    %16 = tpu.reciprocal %15 {approx = true} : vector<16x1xf32> -> vector<16x1xf32>
    %17 = arith.mulf %15, %16 : vector<16x1xf32>
    %cst_8 = arith.constant 2.000000e+00 : f32
    %18 = vector.broadcast %cst_8 : f32 to vector<16x1xf32>
    %19 = arith.subf %18, %17 : vector<16x1xf32>
    %20 = arith.mulf %16, %19 : vector<16x1xf32>
    %21 = vector.broadcast %20 : vector<16x1xf32> to vector<16x12xf32>
    %22 = arith.mulf %13, %21 : vector<16x12xf32>
    %23 = arith.truncf %22 : vector<16x12xf32> to vector<16x12xbf16>
    %24 = vector.shape_cast %23 : vector<16x12xbf16> to vector<16x1x12xbf16>
    "tpu.trace_start"() <{level = 10 : i32, message = "bqk,bkd->bqd"}> : () -> ()
    %cst_9 = arith.constant dense<0.000000e+00> : vector<16x1x128xf32>
    %25 = tpu.matmul %24, %0, %cst_9 {dimension_numbers = #tpu.dot_dimension_numbers<[2], [1], [1], [2], [0, 0, 0, 1, 1, 2], [0], [0]>} : vector<16x1x12xbf16>, vector<16x12x128xbf16>, vector<16x1x128xf32> -> vector<16x1x128xf32>
    "tpu.trace_stop"() : () -> ()
    %26 = vector.shape_cast %25 : vector<16x1x128xf32> to vector<16x128xf32>
    %c0_10 = arith.constant 0 : index
    %c0_11 = arith.constant 0 : index
    %27 = vector.load %arg4[%c0_10, %c0_11] : memref<16x128xf32, #tpu.memory_space<vmem>>, vector<16x128xf32>
    tpu.vector_store %arg4[%c0_10, %c0_11], %26 {strides = array<i32>} : memref<16x128xf32, #tpu.memory_space<vmem>>, vector<16x128xf32>,
    return
  }
  func.func @transform_0(%arg0: i32) -> (i32, i32) {
    %c0_i32 = arith.constant 0 : i32
    %c0_i32_0 = arith.constant 0 : i32
    return %arg0, %c0_i32 : i32, i32
  }
  func.func @transform_1(%arg0: i32) -> (i32, i32) {
    %c0_i32 = arith.constant 0 : i32
    %c0_i32_0 = arith.constant 0 : i32
    return %arg0, %c0_i32 : i32, i32
  }
  func.func @transform_2(%arg0: i32) -> (i32, i32, i32) {
    %c0_i32 = arith.constant 0 : i32
    %c0_i32_0 = arith.constant 0 : i32
    %c0_i32_1 = arith.constant 0 : i32
    return %arg0, %c0_i32, %c0_i32_0 : i32, i32, i32
  }
  func.func @transform_3(%arg0: i32) -> (i32, i32) {
    %c0_i32 = arith.constant 0 : i32
    %c0_i32_0 = arith.constant 0 : i32
    return %arg0, %c0_i32 : i32, i32
  }
}

</mosaic_0001>

<bundles_post_ra>
// kernel: object_features_and_text.1
= control target key start
LH: loop header
LB: loop body
LE: loop exit
PB: predicated region body
PF: predicated region fallthrough
CT: control target
= control target key end

     0   :  { %v65_v0 = vlaneseq  ;;  %v3099_v2 = vmov 1966171168   ;;  %vm456_vm0 = vcmask 1043456   ;;  %s3950_s0 = inlined_call_operand.vmem [shape: bf16[16,128], index: 0, kind: input, shape index: {}]   ;;  %s3951_s1 = inlined_call_operand.vmem [shape: f32[16,12], index: 1, kind: input, shape index: {}]   ;;  %s3952_s2 = inlined_call_operand.vmem [shape: bf16[16,12,128], index: 2, kind: input, shape index: {}]   ;;  %s3953_s3 = inlined_call_operand.hbm [shape: f32[16,128], index: 3, kind: output, shape index: {}]  }
   0x1   :  { %v2798_v1 = vld.sshfl [vmem:[%s3950_s0] sm:$0x33 pattern:$0x75316420]  ;;  %v63_v3 = vunpack.c.l.s4 %v3099_v2  ;;  %v2978_v31 = vld [vmem:[%s3952_s2 + $0x10] sm:$0x3f]  }
   0x2   :  { %v3129_v4 = vshrl.u32 %v65_v0, 7  ;;  %v906_v5 = vand.u32 127, %v65_v0  ;;  %v61_v6 = vcombine.high %v2798_v1, %v2798_v1  ;;  %v2977_v25 = vld [vmem:[%s3952_s2] sm:$0x3f]   ;;  %v2979_v41 = vld [vmem:[%s3952_s2 + $0x8] sm:$0x3f]  }
   0x3   :  { %v64_v7 = vunpack.c.0.s8 %v63_v3 }
   0x4   :  { %v3132_v8 = vsub.s32 %v906_v5, %v3129_v4  ;;  %v911_v9 = vadd.s32 4294967288, %v906_v5  ;;  %v3142_v13 = vsub.s32 0, %v3129_v4 }
   0x5   :  { %v3135_v10 = vsub.s32 %v64_v7, %v3129_v4 }
   0x6   :  { %v3138_v11 = vsub.s32 %v911_v9, %v3129_v4 }
   0x7   :  { %v68_v12 = vrot.slane %v2798_v1, %v3135_v10  ;;  %v75_v14 = vrot.slane %v61_v6, %v3135_v10 }
   0x9   :  { %v2800_v15 = vpack.i.b16 %v68_v12, %v68_v12  ;;  %v2801_v16 = vpack.i.b16 %v75_v14, %v75_v14  ;;  %v103_v17 = vunpack.i.h.s16 %v68_v12  ;;  %v105_v18 = vunpack.i.h.s16 %v75_v14 }
   0xa   :  { %v76_v19 = vcombine.high %v68_v12, %v68_v12  ;;  %v77_v20 = vcombine.high %v75_v14, %v75_v14 }
   0xb   :  { %v137_v21 = vrot.slane %v2800_v15, %v3142_v13  ;;  %v145_v22 = vrot.slane %v2801_v16, %v3142_v13  ;;  %v119_v23 = vpack.i.b16 %v103_v17, %v103_v17  ;;  %v121_v24 = vpack.i.b16 %v105_v18, %v105_v18 }
   0xc   :  { %v2802_v26 = vpack.i.b16 %v76_v19, %v76_v19  ;;  %v2803_v27 = vpack.i.b16 %v77_v20, %v77_v20  ;;  %v107_v28 = vunpack.i.h.s16 %v76_v19  ;;  %v109_v37 = vunpack.i.h.s16 %v77_v20 }
   0xd   :  { %v199_v29 = vpack.i.b16 %v137_v21, %v137_v21  ;;  %v213_v30 = vpack.i.b16 %v145_v22, %v145_v22  ;;  %v141_v32 = vrot.slane %v119_v23, %v3142_v13  ;;  %v149_v33 = vrot.slane %v121_v24, %v3142_v13 }
   0xe   :  { %v153_v34 = vrot.slane %v2802_v26, %v3142_v13  ;;  %v161_v35 = vrot.slane %v2803_v27, %v3142_v13  ;;  %v123_v36 = vpack.i.b16 %v107_v28, %v107_v28  ;;  %v125_v49 = vpack.i.b16 %v109_v37, %v109_v37 }
   0xf   :  { %v204_v38 = vrot.slane %v199_v29, %v3142_v13  ;;  %v218_v39 = vrot.slane %v213_v30, %v3142_v13  ;;  %v206_v40 = vpack.i.b16 %v141_v32, %v141_v32  ;;  %v220_v42 = vpack.i.b16 %v149_v33, %v149_v33 }
  0x10   :  { %v227_v43 = vpack.i.b16 %v153_v34, %v153_v34  ;;  %v241_v44 = vpack.i.b16 %v161_v35, %v161_v35  ;;  %v157_v45 = vrot.slane %v123_v36, %v3142_v13 }
  0x11   :  { %v406_v46 = vmul.bf16 %v2977_v25, %v204_v38  ;;  %v408_v47 = vmul.bf16 %v2978_v31, %v218_v39  ;;  %v211_v48 = vrot.slane %v206_v40, %v3142_v13 }
  0x12   :  { %8 = vsyncpa [#allocation3], 0  ;;  %v225_v53 = vrot.slane %v220_v42, %v3142_v13  ;;  %v2980_v54 = vld [vmem:[%s3952_s2 + $0x18] sm:$0x3f]   ;;  %v232_v55 = vrot.slane %v227_v43, %v3142_v13  ;;  %v2981_v56 = vld [vmem:[%s3952_s2 + $0x20] sm:$0x3f]   ;;  %v246_v57 = vrot.slane %v241_v44, %v3142_v13  ;;  %v234_v59 = vpack.i.b16 %v157_v45, %v157_v45 }
  0x13   :  { %v422_v50 = vunpack.c.l.bf16 %v406_v46  ;;  %v427_v51 = vunpack.c.h.bf16 %v408_v47  ;;  %v407_v52 = vmul.bf16 %v2979_v41, %v211_v48  ;;  %v2982_v58 = vld [vmem:[%s3952_s2 + $0x30] sm:$0x3f]   ;;  %v426_v61 = vunpack.c.l.bf16 %v408_v47  ;;  %v2983_v7 = vld [vmem:[%s3952_s2 + $0x28] sm:$0x3f]   ;;  %v2984_v25 = vld [vmem:[%s3952_s2 + $0x38] sm:$0x3f]  }
  0x14   :  { %v423_v63 = vunpack.c.h.bf16 %v406_v46  ;;  %v165_v0 = vrot.slane %v125_v49, %v3142_v13  ;;  %v409_v2 = vmul.bf16 %v2980_v54, %v225_v53  ;;  %v410_v3 = vmul.bf16 %v2981_v56, %v232_v55  ;;  %v2799_v14 = vld.sshfl [vmem:[%s3950_s0 + $0x4] sm:$0x33 pattern:$0x75316420]  ;;  %v2986_v53 = vld [vmem:[%s3952_s2 + $0x48] sm:$0x3f]  }
  0x15   :  { %454 = vadd.xlane.f32.xlu0 %v422_v50  ;;  %v467_v60 = vsel %vm456_vm0, %v427_v51, 0.0  ;;  %v424_v62 = vunpack.c.l.bf16 %v407_v52  ;;  %v425_v1 = vunpack.c.h.bf16 %v407_v52  ;;  %v3178_v5 = vmul.bf16 %v2982_v58, %v246_v57  ;;  %v2985_v44 = vld [vmem:[%s3952_s2 + $0x40] sm:$0x3f]   ;;  %v2987_v58 = vld [vmem:[%s3952_s2 + $0x50] sm:$0x3f]  }
  0x16   :  { %468 = vadd.xlane.f32.xlu1 %v467_v60  ;;  %v239_v6 = vrot.slane %v234_v59, %v3142_v13  ;;  %v457_v9 = vsel %vm456_vm0, %v423_v63, 0.0  ;;  %v248_v12 = vpack.i.b16 %v165_v0, %v165_v0  ;;  %v429_v16 = vunpack.c.h.bf16 %v409_v2  ;;  %v2989_v55 = vld [vmem:[%s3952_s2 + $0x60] sm:$0x3f]  }
  0x17   :  { %v462_v15 = vsel %vm456_vm0, %v425_v1, 0.0  ;;  %v431_v17 = vunpack.c.h.bf16 %v410_v3  ;;  %v435_v18 = vunpack.c.h.bf16 %v3178_v5  ;;  %v428_v20 = vunpack.c.l.bf16 %v409_v2 }
  0x18   :  { %v3190_v19 = vmul.bf16 %v2983_v7, %v239_v6  ;;  %v92_v21 = vrot.slane %v2799_v14, %v3135_v10  ;;  %v430_v22 = vunpack.c.l.bf16 %v410_v3  ;;  %v434_v23 = vunpack.c.l.bf16 %v3178_v5  ;;  %v2988_v6 = vld [vmem:[%s3952_s2 + $0x58] sm:$0x3f]  }
  0x19   :  { %465 = vadd.xlane.f32.xlu0 %v426_v61  ;;  %v253_v24 = vrot.slane %v248_v12, %v3142_v13  ;;  %v85_v26 = vcombine.high %v2799_v14, %v2799_v14  ;;  %v472_v27 = vsel %vm456_vm0, %v429_v16, 0.0  ;;  %v477_v31 = vsel %vm456_vm0, %v431_v17, 0.0  ;;  %v2991_v16 = vld [vmem:[%s3952_s2 + $0x70] sm:$0x3f]  }
  0x1a   :  { %460 = vadd.xlane.f32.xlu1 %v424_v62  ;;  %v2804_v28 = vpack.i.b16 %v92_v21, %v92_v21  ;;  %v111_v29 = vunpack.i.h.s16 %v92_v21  ;;  %v100_v30 = vcombine.high %v92_v21, %v92_v21  ;;  %v487_v32 = vsel %vm456_vm0, %v435_v18, 0.0 }
  0x1b   :  { %v433_v33 = vunpack.c.h.bf16 %v3190_v19  ;;  %v99_v34 = vrot.slane %v85_v26, %v3135_v10  ;;  %v3204_v39 = vmul.bf16 %v2984_v25, %v253_v24  ;;  %v432_v2 = vunpack.c.l.bf16 %v3190_v19 }
  0x1c   :  { %v169_v35 = vrot.slane %v2804_v28, %v3142_v13  ;;  %v127_v36 = vpack.i.b16 %v111_v29, %v111_v29  ;;  %v2806_v37 = vpack.i.b16 %v100_v30, %v100_v30  ;;  %v115_v38 = vunpack.i.h.s16 %v100_v30 }
  0x1d   :  { %458 = vadd.xlane.f32.xlu0 %v457_v9  ;;  %v2805_v40 = vpack.i.b16 %v99_v34, %v99_v34  ;;  %v113_v41 = vunpack.i.h.s16 %v99_v34  ;;  %v101_v42 = vcombine.high %v99_v34, %v99_v34  ;;  %v436_v26 = vunpack.c.l.bf16 %v3204_v39 }
  0x1e   :  { %463 = vadd.xlane.f32.xlu1 %v462_v15  ;;  %v255_v43 = vpack.i.b16 %v169_v35, %v169_v35  ;;  %v173_v45 = vrot.slane %v127_v36, %v3142_v13  ;;  %v185_v10 = vrot.slane %v2806_v37, %v3142_v13  ;;  %v131_v46 = vpack.i.b16 %v115_v38, %v115_v38  ;;  %v2990_v15 = vld [vmem:[%s3952_s2 + $0x68] sm:$0x3f]   ;;  %v2992_v37 = vld [vmem:[%s3952_s2 + $0x78] sm:$0x3f]  }
  0x1f   :  { %v177_v47 = vrot.slane %v2805_v40, %v3142_v13  ;;  %v129_v48 = vpack.i.b16 %v113_v41, %v113_v41  ;;  %v2807_v49 = vpack.i.b16 %v101_v42, %v101_v42  ;;  %v117_v50 = vunpack.i.h.s16 %v101_v42 }
  0x20   :  { %v260_v51 = vrot.slane %v255_v43, %v3142_v13  ;;  %v262_v52 = vpack.i.b16 %v173_v45, %v173_v45  ;;  %v283_v54 = vpack.i.b16 %v185_v10, %v185_v10  ;;  %v189_v56 = vrot.slane %v131_v46, %v3142_v13 }
  0x21   :  { %470 = vadd.xlane.f32.xlu0 %v428_v20  ;;  %v269_v57 = vpack.i.b16 %v177_v47, %v177_v47  ;;  %v181_v59 = vrot.slane %v129_v48, %v3142_v13  ;;  %v193_v60 = vrot.slane %v2807_v49, %v3142_v13  ;;  %v133_v61 = vpack.i.b16 %v117_v50, %v117_v50  ;;  %v50_v47 = vld [vmem:[%s3951_s1] sm:$0xff] }
  0x22   :  { %473 = vadd.xlane.f32.xlu1 %v472_v27  ;;  %v3225_v62 = vmul.bf16 %v2985_v44, %v260_v51  ;;  %v267_v63 = vrot.slane %v262_v52, %v3142_v13  ;;  %v288_v0 = vrot.slane %v283_v54, %v3142_v13  ;;  %v290_v1 = vpack.i.b16 %v189_v56, %v189_v56 }
  0x23   :  { %v274_v3 = vrot.slane %v269_v57, %v3142_v13  ;;  %v276_v5 = vpack.i.b16 %v181_v59, %v181_v59  ;;  %v297_v7 = vpack.i.b16 %v193_v60, %v193_v60  ;;  %v197_v17 = vrot.slane %v133_v61, %v3142_v13 }
  0x24   :  { %v3234_v9 = vmul.bf16 %v2986_v53, %v267_v63  ;;  %v439_v12 = vunpack.c.h.bf16 %v3225_v62  ;;  %v3237_v14 = vmul.bf16 %v2989_v55, %v288_v0  ;;  %v295_v20 = vrot.slane %v290_v1, %v3142_v13 }
  0x25   :  { %475 = vadd.xlane.f32.xlu0 %v430_v22  ;;  %v3246_v18 = vmul.bf16 %v2987_v58, %v274_v3  ;;  %v281_v19 = vrot.slane %v276_v5, %v3142_v13  ;;  %v302_v21 = vrot.slane %v297_v7, %v3142_v13  ;;  %v482_v22 = vsel %vm456_vm0, %v433_v33, 0.0 }
  0x26   :  { %478 = vadd.xlane.f32.xlu1 %v477_v31  ;;  %v441_v24 = vunpack.c.h.bf16 %v3234_v9  ;;  %v3255_v25 = vsel %vm456_vm0, %v439_v12, 0.0  ;;  %v447_v29 = vunpack.c.h.bf16 %v3237_v14  ;;  %v3263_v31 = vmul.bf16 %v2990_v15, %v295_v20 }
  0x27   :  { %v443_v27 = vunpack.c.h.bf16 %v3246_v18  ;;  %v3259_v28 = vmul.bf16 %v2988_v6, %v281_v19  ;;  %v304_v33 = vpack.i.b16 %v197_v17, %v197_v17  ;;  %v540_v48 = vrot.slane %v50_v47, %v3142_v13 }
  0x28   :  { %v502_v30 = vsel %vm456_vm0, %v441_v24, 0.0  ;;  %v3270_v36 = vsel %vm456_vm0, %v447_v29, 0.0  ;;  %v3288_v49 = vsub.s32 1, %v3129_v4  ;;  %v3292_v51 = vsub.s32 2, %v3129_v4 }
  0x29   :  { %485 = vadd.xlane.f32.xlu0 %v434_v23  ;;  %v437_v23 = vunpack.c.h.bf16 %v3204_v39  ;;  %v507_v34 = vsel %vm456_vm0, %v443_v27, 0.0  ;;  %v445_v35 = vunpack.c.h.bf16 %v3259_v28  ;;  %v449_v39 = vunpack.c.h.bf16 %v3263_v31 }
  0x2a   :  { %488 = vadd.xlane.f32.xlu1 %v487_v32  ;;  %v3265_v32 = vmul.bf16 %v2991_v16, %v302_v21  ;;  %v309_v42 = vrot.slane %v304_v33, %v3142_v13  ;;  %v551_v50 = vrot.slane %v50_v47, %v3288_v49  ;;  %v562_v52 = vrot.slane %v50_v47, %v3292_v51 }
  0x2b   :  { %v492_v38 = vsel %vm456_vm0, %v437_v23, 0.0  ;;  %v512_v41 = vsel %vm456_vm0, %v445_v35, 0.0  ;;  %v522_v43 = vsel %vm456_vm0, %v449_v39, 0.0  ;;  %v3296_v53 = vsub.s32 3, %v3129_v4 }
  0x2c   :  { %v451_v40 = vunpack.c.h.bf16 %v3265_v32  ;;  %v421_v45 = vmul.bf16 %v2992_v37, %v309_v42  ;;  %v3300_v55 = vsub.s32 4, %v3129_v4  ;;  %v3304_v57 = vsub.s32 5, %v3129_v4 }
  0x2d   :  { %480 = vadd.xlane.f32.xlu0 %v432_v2  ;;  %v573_v54 = vrot.slane %v50_v47, %v3296_v53  ;;  %v3100_v58 = vmov 0   ;;  %v3308_v60 = vsub.s32 6, %v3129_v4  ;;  %v3312_v63 = vsub.s32 7, %v3129_v4 }
  0x2e   :  { %483 = vadd.xlane.f32.xlu1 %v482_v22  ;;  %v527_v44 = vsel %vm456_vm0, %v451_v40, 0.0  ;;  %v453_v10 = vunpack.c.h.bf16 %v421_v45  ;;  %v584_v56 = vrot.slane %v50_v47, %v3300_v55  ;;  %2975 = vset.pattern.permute.xlu0 %v3100_v58  ;;  %v595_v59 = vrot.slane %v50_v47, %v3304_v57 }
  0x2f   :  { %2976 = vset.pattern.permute.xlu1 %v3100_v58  ;;  %v606_v61 = vrot.slane %v50_v47, %v3308_v60  ;;  %v617_v0 = vrot.slane %v50_v47, %v3312_v63  ;;  %v438_v1 = vunpack.c.l.bf16 %v3225_v62  ;;  %v440_v2 = vunpack.c.l.bf16 %v3234_v9 }
  0x30   :  { %v532_v46 = vsel %vm456_vm0, %v453_v10, 0.0  ;;  %v442_v3 = vunpack.c.l.bf16 %v3246_v18  ;;  %v444_v4 = vunpack.c.l.bf16 %v3259_v28  ;;  %v446_v5 = vunpack.c.l.bf16 %v3237_v14  ;;  %v51_v18 = vld [vmem:[%s3951_s1 + $0x8] sm:$0xff] }
  0x31   :  { %490 = vadd.xlane.f32.xlu0 %v436_v26  ;;  %v448_v62 = vunpack.c.l.bf16 %v3263_v31  ;;  %v450_v6 = vunpack.c.l.bf16 %v3265_v32  ;;  %v452_v7 = vunpack.c.l.bf16 %v421_v45  ;;  %v628_v21 = vrot.slane %v51_v18, %v3142_v13 }
  0x32   :  { %493 = vadd.xlane.f32.xlu1 %v492_v38  ;;  %v639_v24 = vrot.slane %v51_v18, %v3288_v49  ;;  %v650_v26 = vrot.slane %v51_v18, %v3292_v51  ;;  %v661_v29 = vrot.slane %v51_v18, %v3296_v53  ;;  %v672_v32 = vrot.slane %v51_v18, %v3300_v55 }
  0x33   :  { %v694_v37 = vrot.slane %v51_v18, %v3308_v60  ;;  %v705_v40 = vrot.slane %v51_v18, %v3312_v63  ;;  %vm916_vm1 = vcmask 130112   ;;  %vm1053_vm2 = vcmask 1041409  }
  0x34   :  { %vm1055_vm3 = vcmask 1042434   ;;  %vm1057_vm4 = vcmask 1043459   ;;  %vm1059_vm5 = vcmask 1044484   ;;  %vm1061_vm6 = vcmask 1045509  }
  0x35   :  { %vm1063_vm7 = vcmask 1046534   ;;  %vm1065_vm8 = vcmask 1047559   ;;  %vm1076_vm9 = vcmask 97280   ;;  %vm1715_vm10 = vcmask 1045504  }
  0x36   :  { %vm3102_vm11 = vmmov 0  }
  0x43   :  { %546 = vbcast.lane.b32.xlu1 %v540_v48, 264 }
  0x47   :  { %553 = vbcast.lane.b32.xlu1 %v551_v50, 256  ;;  %542 = vbcast.lane.b32.xlu0 %v540_v48, 256 }
  0x4b   :  { %557 = vbcast.lane.b32.xlu1 %v551_v50, 264  ;;  %564 = vbcast.lane.b32.xlu0 %v562_v52, 256 }
  0x4f   :  { %568 = vbcast.lane.b32.xlu1 %v562_v52, 264  ;;  %575 = vbcast.lane.b32.xlu0 %v573_v54, 256 }
  0x53   :  { %579 = vbcast.lane.b32.xlu1 %v573_v54, 264  ;;  %586 = vbcast.lane.b32.xlu0 %v584_v56, 256 }
  0x57   :  { %590 = vbcast.lane.b32.xlu1 %v584_v56, 264  ;;  %597 = vbcast.lane.b32.xlu0 %v595_v59, 256 }
  0x5b   :  { %601 = vbcast.lane.b32.xlu1 %v595_v59, 264  ;;  %608 = vbcast.lane.b32.xlu0 %v606_v61, 256 }
  0x5f   :  { %612 = vbcast.lane.b32.xlu1 %v606_v61, 264  ;;  %619 = vbcast.lane.b32.xlu0 %v617_v0, 256 }
  0x63   :  { %623 = vbcast.lane.b32.xlu1 %v617_v0, 264 }
  0x7e   :  { %495 = vadd.xlane.f32.xlu0 %v438_v1 }
  0x82   :  { %500 = vadd.xlane.f32.xlu0 %v440_v2 }
  0x86   :  { %503 = vadd.xlane.f32.xlu0 %v502_v30 }
  0x87   :  { %498 = vadd.xlane.f32.xlu1 %v3255_v25 }
  0x8a   :  { %505 = vadd.xlane.f32.xlu0 %v442_v3 }
  0x8b   :  { %508 = vadd.xlane.f32.xlu1 %v507_v34  ;;  %v683_v34 = vrot.slane %v51_v18, %v3304_v57 }
  0x8e   :  { %510 = vadd.xlane.f32.xlu0 %v444_v4 }
  0x8f   :  { %513 = vadd.xlane.f32.xlu1 %v512_v41 }
  0x92   :  { %515 = vadd.xlane.f32.xlu0 %v446_v5 }
  0x93   :  { %518 = vadd.xlane.f32.xlu1 %v3270_v36 }
  0x96   :  { %520 = vadd.xlane.f32.xlu0 %v448_v62 }
  0x97   :  { %523 = vadd.xlane.f32.xlu1 %v522_v43 }
  0x9a   :  { %525 = vadd.xlane.f32.xlu0 %v450_v6 }
  0x9b   :  { %528 = vadd.xlane.f32.xlu1 %v527_v44 }
  0x9e   :  { %530 = vadd.xlane.f32.xlu0 %v452_v7  ;;  %v455_v9 = vpop.xlane.xlu0 %454 }
  0x9f   :  { %v469_v12 = vpop.xlane.xlu1 %468  ;;  %533 = vadd.xlane.f32.xlu1 %v532_v46 }
  0xa2   :  { %v466_v15 = vpop.xlane.xlu0 %465 }
  0xa3   :  { %v461_v16 = vpop.xlane.xlu1 %460 }
  0xa6   :  { %v459_v14 = vpop.xlane.xlu0 %458 }
  0xa7   :  { %v464_v17 = vpop.xlane.xlu1 %463 }
  0xaa   :  { %v471_v19 = vpop.xlane.xlu0 %470 }
  0xab   :  { %v474_v20 = vpop.xlane.xlu1 %473 }
  0xae   :  { %v476_v22 = vpop.xlane.xlu0 %475 }
  0xaf   :  { %v479_v23 = vpop.xlane.xlu1 %478 }
  0xb0   :  { %634 = vbcast.lane.b32.xlu1 %v628_v21, 264 }
  0xb2   :  { %v3332_v27 = vpop.xlane.xlu0 %485 }
  0xb3   :  { %v3329_v25 = vpop.xlane.xlu1 %488 }
  0xb4   :  { %641 = vbcast.lane.b32.xlu1 %v639_v24, 256  ;;  %630 = vbcast.lane.b32.xlu0 %v628_v21, 256 }
  0xb6   :  { %v481_v30 = vpop.xlane.xlu0 %480 }
  0xb7   :  { %v484_v28 = vpop.xlane.xlu1 %483 }
  0xb8   :  { %645 = vbcast.lane.b32.xlu1 %v639_v24, 264  ;;  %652 = vbcast.lane.b32.xlu0 %v650_v26, 256 }
  0xba   :  { %v491_v35 = vpop.xlane.xlu0 %490 }
  0xbb   :  { %v494_v31 = vpop.xlane.xlu1 %493 }
  0xbc   :  { %656 = vbcast.lane.b32.xlu1 %v650_v26, 264  ;;  %663 = vbcast.lane.b32.xlu0 %v661_v29, 256 }
  0xbe   :  { %v543_v38 = vpop.permute.xlu0 %542 }
  0xbf   :  { %v547_v33 = vpop.permute.xlu1 %546  ;;  %v3339_v43 = vadd.f32 %v543_v38, %v455_v9 }
  0xc0   :  { %667 = vbcast.lane.b32.xlu1 %v661_v29, 264  ;;  %674 = vbcast.lane.b32.xlu0 %v672_v32, 256  ;;  %v3342_v45 = vadd.f32 %v547_v33, %v459_v14 }
  0xc2   :  { %v565_v42 = vpop.permute.xlu0 %564 }
  0xc3   :  { %v554_v36 = vpop.permute.xlu1 %553  ;;  %v3354_v54 = vadd.f32 %v565_v42, %v466_v15 }
  0xc4   :  { %678 = vbcast.lane.b32.xlu1 %v672_v32, 264  ;;  %685 = vbcast.lane.b32.xlu0 %v683_v34, 256  ;;  %v3348_v48 = vadd.f32 %v554_v36, %v461_v16 }
  0xc6   :  { %v576_v46 = vpop.permute.xlu0 %575 }
  0xc7   :  { %v558_v39 = vpop.permute.xlu1 %557  ;;  %v3360_v59 = vadd.f32 %v576_v46, %v471_v19 }
  0xc8   :  { %689 = vbcast.lane.b32.xlu1 %v683_v34, 264  ;;  %696 = vbcast.lane.b32.xlu0 %v694_v37, 256  ;;  %v3344_v10 = vadd.f32 %v558_v39, %v464_v17 }
  0xca   :  { %v587_v52 = vpop.permute.xlu0 %586 }
  0xcb   :  { %v569_v41 = vpop.permute.xlu1 %568  ;;  %v3366_v2 = vadd.f32 %v587_v52, %v476_v22 }
  0xcc   :  { %700 = vbcast.lane.b32.xlu1 %v694_v37, 264  ;;  %707 = vbcast.lane.b32.xlu0 %v705_v40, 256  ;;  %v3350_v50 = vadd.f32 %v569_v41, %v469_v12 }
  0xce   :  { %v598_v0 = vpop.permute.xlu0 %597 }
  0xcf   :  { %v580_v44 = vpop.permute.xlu1 %579  ;;  %v3372_v5 = vadd.f32 %v598_v0, %v481_v30 }
  0xd0   :  { %711 = vbcast.lane.b32.xlu1 %v705_v40, 264  ;;  %810 = vperm.xlu0 %2975, %v3339_v43   ;;  %v3356_v56 = vadd.f32 %v580_v44, %v474_v20 }
  0xd2   :  { %v609_v4 = vpop.permute.xlu0 %608 }
  0xd3   :  { %v591_v47 = vpop.permute.xlu1 %590  ;;  %v3380_v7 = vadd.f32 %v609_v4, %v3332_v27 }
  0xd4   :  { %813 = vperm.xlu1 %2976, %v3342_v45   ;;  %819 = vperm.xlu0 %2975, %v3344_v10   ;;  %v3362_v61 = vadd.f32 %v591_v47, %v479_v23 }
  0xd6   :  { %v620_v12 = vpop.permute.xlu0 %619 }
  0xd7   :  { %v602_v58 = vpop.permute.xlu1 %601  ;;  %v3386_v15 = vadd.f32 %v620_v12, %v491_v35 }
  0xd8   :  { %816 = vperm.xlu1 %2976, %v3348_v48   ;;  %825 = vperm.xlu0 %2975, %v3350_v50   ;;  %v3368_v3 = vadd.f32 %v602_v58, %v484_v28 }
  0xdb   :  { %v613_v1 = vpop.permute.xlu1 %612 }
  0xdc   :  { %831 = vperm.xlu0 %2975, %v3356_v56   ;;  %822 = vperm.xlu1 %2976, %v3354_v54   ;;  %v3375_v62 = vadd.f32 %v613_v1, %v3329_v25 }
  0xdf   :  { %v624_v6 = vpop.permute.xlu1 %623 }
  0xe0   :  { %837 = vperm.xlu0 %2975, %v3362_v61   ;;  %828 = vperm.xlu1 %2976, %v3360_v59   ;;  %v3382_v9 = vadd.f32 %v624_v6, %v494_v31 }
  0xe4   :  { %843 = vperm.xlu0 %2975, %v3368_v3   ;;  %834 = vperm.xlu1 %2976, %v3366_v2  }
  0xe8   :  { %849 = vperm.xlu0 %2975, %v3375_v62   ;;  %840 = vperm.xlu1 %2976, %v3372_v5  }
  0xec   :  { %855 = vperm.xlu0 %2975, %v3382_v9   ;;  %846 = vperm.xlu1 %2976, %v3380_v7  }
  0xf0   :  { %852 = vperm.xlu1 %2976, %v3386_v15  }
 0x107   :  { %v496_v16 = vpop.xlane.xlu0 %495 }
 0x10b   :  { %v501_v14 = vpop.xlane.xlu0 %500 }
 0x10f   :  { %v504_v17 = vpop.xlane.xlu0 %503 }
 0x110   :  { %v499_v18 = vpop.xlane.xlu1 %498 }
 0x113   :  { %v506_v19 = vpop.xlane.xlu0 %505 }
 0x114   :  { %v509_v20 = vpop.xlane.xlu1 %508 }
 0x117   :  { %v511_v21 = vpop.xlane.xlu0 %510 }
 0x118   :  { %v514_v22 = vpop.xlane.xlu1 %513 }
 0x11b   :  { %v516_v23 = vpop.xlane.xlu0 %515 }
 0x11c   :  { %v519_v24 = vpop.xlane.xlu1 %518 }
 0x11f   :  { %v521_v25 = vpop.xlane.xlu0 %520 }
 0x120   :  { %v524_v26 = vpop.xlane.xlu1 %523 }
 0x123   :  { %v526_v27 = vpop.xlane.xlu0 %525 }
 0x124   :  { %v529_v28 = vpop.xlane.xlu1 %528 }
 0x127   :  { %v531_v29 = vpop.xlane.xlu0 %530 }
 0x128   :  { %v534_v30 = vpop.xlane.xlu1 %533 }
 0x12b   :  { %v631_v31 = vpop.permute.xlu0 %630 }
 0x12c   :  { %v3389_v32 = vadd.f32 %v631_v31, %v496_v16  ;;  %v635_v33 = vpop.permute.xlu1 %634 }
 0x12d   :  { %v3391_v34 = vadd.f32 %v635_v33, %v499_v18 }
 0x12e   :  { %858 = vperm.xlu1 %2976, %v3389_v32  }
 0x12f   :  { %861 = vperm.xlu0 %2975, %v3391_v34   ;;  %v653_v35 = vpop.permute.xlu0 %652 }
 0x130   :  { %v642_v36 = vpop.permute.xlu1 %641  ;;  %v3398_v40 = vadd.f32 %v653_v35, %v506_v19 }
 0x131   :  { %v3395_v37 = vadd.f32 %v642_v36, %v501_v14 }
 0x133   :  { %864 = vperm.xlu1 %2976, %v3395_v37   ;;  %v664_v38 = vpop.permute.xlu0 %663 }
 0x134   :  { %v646_v39 = vpop.permute.xlu1 %645  ;;  %v3404_v46 = vadd.f32 %v664_v38, %v511_v21 }
 0x135   :  { %v3400_v41 = vadd.f32 %v646_v39, %v504_v17 }
 0x137   :  { %867 = vperm.xlu0 %2975, %v3400_v41   ;;  %870 = vperm.xlu1 %2976, %v3398_v40   ;;  %v675_v42 = vpop.permute.xlu0 %674 }
 0x138   :  { %v657_v44 = vpop.permute.xlu1 %656  ;;  %v3410_v0 = vadd.f32 %v675_v42, %v516_v23 }
 0x139   :  { %v3406_v47 = vadd.f32 %v657_v44, %v509_v20 }
 0x13b   :  { %873 = vperm.xlu0 %2975, %v3406_v47   ;;  %876 = vperm.xlu1 %2976, %v3404_v46   ;;  %v686_v52 = vpop.permute.xlu0 %685 }
 0x13c   :  { %v668_v58 = vpop.permute.xlu1 %667  ;;  %v3416_v12 = vadd.f32 %v686_v52, %v521_v25 }
 0x13d   :  { %v3412_v1 = vadd.f32 %v668_v58, %v514_v22 }
 0x13f   :  { %879 = vperm.xlu0 %2975, %v3412_v1   ;;  %882 = vperm.xlu1 %2976, %v3410_v0   ;;  %v697_v4 = vpop.permute.xlu0 %696 }
 0x140   :  { %v679_v6 = vpop.permute.xlu1 %678  ;;  %v3422_v17 = vadd.f32 %v697_v4, %v526_v27 }
 0x141   :  { %v3418_v16 = vadd.f32 %v679_v6, %v519_v24 }
 0x143   :  { %885 = vperm.xlu0 %2975, %v3418_v16   ;;  %888 = vperm.xlu1 %2976, %v3416_v12   ;;  %v708_v19 = vpop.permute.xlu0 %707 }
 0x144   :  { %v690_v14 = vpop.permute.xlu1 %689  ;;  %v3428_v21 = vadd.f32 %v708_v19, %v531_v29 }
 0x145   :  { %v3424_v18 = vadd.f32 %v690_v14, %v524_v26 }
 0x146   :  { %3957 = vst [vmem:[#allocation5_spill] sm:$0xff] %v3428_v21 }
 0x147   :  { %891 = vperm.xlu0 %2975, %v3424_v18   ;;  %894 = vperm.xlu1 %2976, %v3422_v17  }
 0x148   :  { %v701_v20 = vpop.permute.xlu1 %700 }
 0x149   :  { %v3430_v22 = vadd.f32 %v701_v20, %v529_v28 }
 0x14b   :  { %897 = vperm.xlu0 %2975, %v3430_v22   ;;  %900 = vperm.xlu1 %2976, %v3428_v21   ;;  %v811_v23 = vpop.permute.xlu0 %810 }
 0x14c   :  { %v712_v24 = vpop.permute.xlu1 %711  ;;  %v910_v20 = vrot.slane %v811_v23, %v3132_v8 }
 0x14d   :  { %v3434_v25 = vadd.f32 %v712_v24, %v534_v30 }
 0x14f   :  { %3958 = vst [vmem:[#allocation6_spill] sm:$0xff] %v3434_v25  ;;  %903 = vperm.xlu0 %2975, %v3434_v25   ;;  %v820_v26 = vpop.permute.xlu0 %819 }
 0x150   :  { %v814_v27 = vpop.permute.xlu1 %813  ;;  %v925_v30 = vrot.slane %v820_v26, %v3138_v11 }
 0x151   :  { %v915_v4 = vrot.slane %v814_v27, %v3138_v11 }
 0x153   :  { %v826_v31 = vpop.permute.xlu0 %825 }
 0x154   :  { %v817_v33 = vpop.permute.xlu1 %816  ;;  %v934_v14 = vrot.slane %v826_v31, %v3138_v11  ;;  %v917_v31 = vsel %vm916_vm1, %v915_v4, %v910_v20 }
 0x155   :  { %v921_v42 = vrot.slane %v817_v33, %v3132_v8 }
 0x157   :  { %v832_v35 = vpop.permute.xlu0 %831  ;;  %v926_v24 = vsel %vm916_vm1, %v925_v30, %v921_v42 }
 0x158   :  { %v823_v36 = vpop.permute.xlu1 %822  ;;  %v943_v33 = vrot.slane %v832_v35, %v3138_v11  ;;  %v1054_v42 = vsel %vm1053_vm2, %v926_v24, %v917_v31 }
 0x159   :  { %v930_v44 = vrot.slane %v823_v36, %v3132_v8 }
 0x15b   :  { %v838_v29 = vpop.permute.xlu0 %837  ;;  %v935_v26 = vsel %vm916_vm1, %v934_v14, %v930_v44 }
 0x15c   :  { %v829_v38 = vpop.permute.xlu1 %828  ;;  %v952_v27 = vrot.slane %v838_v29, %v3138_v11  ;;  %v1056_v29 = vsel %vm1055_vm3, %v935_v26, %v1054_v42 }
 0x15d   :  { %v939_v6 = vrot.slane %v829_v38, %v3132_v8 }
 0x15f   :  { %v844_v28 = vpop.permute.xlu0 %843  ;;  %v944_v25 = vsel %vm916_vm1, %v943_v33, %v939_v6 }
 0x160   :  { %v835_v39 = vpop.permute.xlu1 %834  ;;  %v1058_v4 = vsel %vm1057_vm4, %v944_v25, %v1056_v29 }
 0x161   :  { %v948_v19 = vrot.slane %v835_v39, %v3132_v8  ;;  %v961_v39 = vrot.slane %v844_v28, %v3138_v11 }
 0x163   :  { %v850_v52 = vpop.permute.xlu0 %849  ;;  %v953_v35 = vsel %vm916_vm1, %v952_v27, %v948_v19 }
 0x164   :  { %v841_v58 = vpop.permute.xlu1 %840  ;;  %v1060_v14 = vsel %vm1059_vm5, %v953_v35, %v1058_v4 }
 0x165   :  { %v957_v36 = vrot.slane %v841_v58, %v3132_v8  ;;  %v970_v58 = vrot.slane %v850_v52, %v3138_v11 }
 0x167   :  { %v856_v44 = vpop.permute.xlu0 %855  ;;  %v962_v30 = vsel %vm916_vm1, %v961_v39, %v957_v36 }
 0x168   :  { %v847_v38 = vpop.permute.xlu1 %846  ;;  %v979_v20 = vrot.slane %v856_v44, %v3138_v11  ;;  %v1062_v52 = vsel %vm1061_vm6, %v962_v30, %v1060_v14 }
 0x169   :  { %v966_v23 = vrot.slane %v847_v38, %v3132_v8 }
 0x16b   :  { %v971_v6 = vsel %vm916_vm1, %v970_v58, %v966_v23 }
 0x16c   :  { %v853_v28 = vpop.permute.xlu1 %852  ;;  %v1064_v33 = vsel %vm1063_vm7, %v971_v6, %v1062_v52 }
 0x16d   :  { %v975_v19 = vrot.slane %v853_v28, %v3132_v8 }
 0x16f   :  { %v980_v24 = vsel %vm916_vm1, %v979_v20, %v975_v19 }
 0x170   :  { %v1066_v25 = vsel %vm1065_vm8, %v980_v24, %v1064_v33 }
 0x171   :  { %v1077_v36 = vsel %vm1076_vm9, %v1066_v25, -inf }
 0x172   :  { %1078 = vmax.xlane.f32.xlu1 %v1077_v36 }
 0x1a9   :  { %v859_v26 = vpop.permute.xlu1 %858 }
 0x1aa   :  { %v862_v27 = vpop.permute.xlu0 %861  ;;  %v984_v14 = vrot.slane %v859_v26, %v3132_v8 }
 0x1ab   :  { %v988_v20 = vrot.slane %v862_v27, %v3138_v11 }
 0x1ad   :  { %v989_v27 = vsel %vm916_vm1, %v988_v20, %v984_v14 }
 0x1ae   :  { %v865_v38 = vpop.permute.xlu1 %864 }
 0x1af   :  { %v993_v19 = vrot.slane %v865_v38, %v3132_v8 }
 0x1b2   :  { %v871_v31 = vpop.permute.xlu1 %870  ;;  %v868_v39 = vpop.permute.xlu0 %867 }
 0x1b3   :  { %v997_v30 = vrot.slane %v868_v39, %v3138_v11  ;;  %v1002_v24 = vrot.slane %v871_v31, %v3132_v8 }
 0x1b5   :  { %v998_v25 = vsel %vm916_vm1, %v997_v30, %v993_v19 }
 0x1b6   :  { %v877_v23 = vpop.permute.xlu1 %876  ;;  %v874_v42 = vpop.permute.xlu0 %873 }
 0x1b7   :  { %v1006_v4 = vrot.slane %v874_v42, %v3138_v11  ;;  %v1011_v36 = vrot.slane %v877_v23, %v3132_v8 }
 0x1b9   :  { %v1007_v42 = vsel %vm916_vm1, %v1006_v4, %v1002_v24 }
 0x1ba   :  { %v883_v35 = vpop.permute.xlu1 %882  ;;  %v880_v58 = vpop.permute.xlu0 %879 }
 0x1bb   :  { %v1015_v52 = vrot.slane %v880_v58, %v3138_v11  ;;  %v1020_v26 = vrot.slane %v883_v35, %v3132_v8 }
 0x1bd   :  { %v1016_v38 = vsel %vm916_vm1, %v1015_v52, %v1011_v36 }
 0x1be   :  { %v889_v44 = vpop.permute.xlu1 %888  ;;  %v886_v29 = vpop.permute.xlu0 %885 }
 0x1bf   :  { %v1024_v33 = vrot.slane %v886_v29, %v3138_v11  ;;  %v1029_v58 = vrot.slane %v889_v44, %v3132_v8  ;;  %v1067_v29 = vsel %vm1053_vm2, %v998_v25, %v989_v27 }
 0x1c0   :  { %v1068_v4 = vsel %vm1055_vm3, %v1007_v42, %v1067_v29 }
 0x1c1   :  { %v1025_v30 = vsel %vm916_vm1, %v1024_v33, %v1020_v26  ;;  %v1069_v19 = vsel %vm1057_vm4, %v1016_v38, %v1068_v4 }
 0x1c2   :  { %v895_v6 = vpop.permute.xlu1 %894  ;;  %v892_v28 = vpop.permute.xlu0 %891  ;;  %v1070_v44 = vsel %vm1059_vm5, %v1025_v30, %v1069_v19 }
 0x1c3   :  { %v1033_v39 = vrot.slane %v892_v28, %v3138_v11  ;;  %v1038_v23 = vrot.slane %v895_v6, %v3132_v8 }
 0x1c5   :  { %v1034_v35 = vsel %vm916_vm1, %v1033_v39, %v1029_v58 }
 0x1c6   :  { %v898_v21 = vpop.permute.xlu0 %897  ;;  %v901_v28 = vpop.permute.xlu1 %900  ;;  %v1071_v24 = vsel %vm1061_vm6, %v1034_v35, %v1070_v44 }
 0x1c7   :  { %v1042_v31 = vrot.slane %v898_v21, %v3138_v11  ;;  %v1047_v21 = vrot.slane %v901_v28, %v3132_v8 }
 0x1c9   :  { %v1043_v14 = vsel %vm916_vm1, %v1042_v31, %v1038_v23 }
 0x1ca   :  { %v904_v20 = vpop.permute.xlu0 %903  ;;  %v1072_v33 = vsel %vm1063_vm7, %v1043_v14, %v1071_v24 }
 0x1cb   :  { %v1051_v52 = vrot.slane %v904_v20, %v3138_v11 }
 0x1cd   :  { %v1052_v6 = vsel %vm916_vm1, %v1051_v52, %v1047_v21 }
 0x1ce   :  { %v1073_v25 = vsel %vm1065_vm8, %v1052_v6, %v1072_v33 }
 0x1cf   :  { %v1080_v36 = vsel %vm1076_vm9, %v1073_v25, -inf }
 0x1d0   :  { %1081 = vmax.xlane.f32.xlu0 %v1080_v36 }
 0x1fb   :  { %v1079_v39 = vpop.xlane.xlu1 %1078 }
 0x1fc   :  { %v1088_v42 = vrot.slane %v1079_v39, %v3142_v13  ;;  %v1092_v26 = vrot.slane %v1079_v39, %v3288_v49  ;;  %v1096_v58 = vrot.slane %v1079_v39, %v3292_v51  ;;  %v1100_v28 = vrot.slane %v1079_v39, %v3296_v53 }
 0x1fd   :  { %v1108_v44 = vrot.slane %v1079_v39, %v3304_v57  ;;  %v1112_v24 = vrot.slane %v1079_v39, %v3308_v60 }
 0x1fe   :  { %v1165_v27 = vsub.f32 %v3339_v43, %v1088_v42  ;;  %v1166_v38 = vsub.f32 %v3342_v45, %v1088_v42  ;;  %v1168_v31 = vsub.f32 %v3344_v10, %v1092_v26  ;;  %v1167_v29 = vsub.f32 %v3348_v48, %v1092_v26 }
 0x1ff   :  { %v1170_v4 = vsub.f32 %v3350_v50, %v1096_v58  ;;  %v1169_v19 = vsub.f32 %v3354_v54, %v1096_v58  ;;  %v1104_v45 = vrot.slane %v1079_v39, %v3300_v55  ;;  %v1172_v14 = vsub.f32 %v3356_v56, %v1100_v28 }
 0x200   :  { %v1197_v30 = vmul.f32 1.442695, %v1165_v27  ;;  %v1199_v23 = vmul.f32 1.442695, %v1166_v38  ;;  %v1203_v35 = vmul.f32 1.442695, %v1168_v31  ;;  %v1171_v48 = vsub.f32 %v3360_v59, %v1100_v28 }
 0x201   :  { %v1201_v43 = vmul.f32 1.442695, %v1167_v29  ;;  %v1207_v10 = vmul.f32 1.442695, %v1170_v4  ;;  %v1205_v20 = vmul.f32 1.442695, %v1169_v19  ;;  %v1174_v50 = vsub.f32 %v3362_v61, %v1104_v45 }
 0x202   :  { %2993 = vpow2.f32 %v1197_v30  ;;  %v1211_v21 = vmul.f32 1.442695, %v1172_v14  ;;  %v1173_v54 = vsub.f32 %v3366_v2, %v1104_v45  ;;  %v1209_v52 = vmul.f32 1.442695, %v1171_v48 }
 0x203   :  { %2995 = vpow2.f32 %v1199_v23  ;;  %v1176_v56 = vsub.f32 %v3368_v3, %v1108_v44  ;;  %v1215_v6 = vmul.f32 1.442695, %v1174_v50  ;;  %v1175_v59 = vsub.f32 %v3372_v5, %v1108_v44 }
 0x204   :  { %2997 = vpow2.f32 %v1203_v35  ;;  %v1213_v25 = vmul.f32 1.442695, %v1173_v54  ;;  %v1116_v61 = vrot.slane %v1079_v39, %v3312_v63  ;;  %v1178_v2 = vsub.f32 %v3375_v62, %v1112_v24 }
 0x205   :  { %2999 = vpow2.f32 %v1201_v43  ;;  %v1219_v3 = vmul.f32 1.442695, %v1176_v56  ;;  %v1177_v26 = vsub.f32 %v3380_v7, %v1112_v24  ;;  %v1217_v5 = vmul.f32 1.442695, %v1175_v59 }
 0x206   :  { %3001 = vpow2.f32 %v1207_v10  ;;  %v1180_v38 = vsub.f32 %v3382_v9, %v1116_v61  ;;  %v1223_v39 = vmul.f32 1.442695, %v1178_v2  ;;  %v1179_v62 = vsub.f32 %v3386_v15, %v1116_v61 }
 0x207   :  { %3003 = vpow2.f32 %v1205_v20  ;;  %v1221_v31 = vmul.f32 1.442695, %v1177_v26 }
 0x208   :  { %3005 = vpow2.f32 %v1211_v21  ;;  %v1227_v7 = vmul.f32 1.442695, %v1180_v38  ;;  %v1225_v9 = vmul.f32 1.442695, %v1179_v62 }
 0x209   :  { %3007 = vpow2.f32 %v1209_v52 }
 0x20a   :  { %3009 = vpow2.f32 %v1215_v6 }
 0x20b   :  { %3011 = vpow2.f32 %v1213_v25 }
 0x20c   :  { %3013 = vpow2.f32 %v1219_v3 }
 0x20d   :  { %3015 = vpow2.f32 %v1217_v5 }
 0x20e   :  { %3017 = vpow2.f32 %v1223_v39 }
 0x20f   :  { %v3519_v33 = vpop.eup %2993  ;;  %3019 = vpow2.f32 %v1221_v31 }
 0x210   :  { %v3522_v36 = vpop.eup %2995  ;;  %1294 = vperm.xlu0 %2975, %v3519_v33   ;;  %3021 = vpow2.f32 %v1227_v7 }
 0x211   :  { %1297 = vperm.xlu1 %2976, %v3522_v36   ;;  %v3528_v42 = vpop.eup %2997  ;;  %3023 = vpow2.f32 %v1225_v9 }
 0x212   :  { %v3531_v27 = vpop.eup %2999 }
 0x213   :  { %v3536_v58 = vpop.eup %3001 }
 0x214   :  { %1303 = vperm.xlu0 %2975, %v3528_v42   ;;  %v3539_v29 = vpop.eup %3003 }
 0x215   :  { %1300 = vperm.xlu1 %2976, %v3531_v27   ;;  %v3543_v30 = vpop.eup %3005 }
 0x216   :  { %v3545_v23 = vpop.eup %3007 }
 0x217   :  { %v3549_v15 = vpop.eup %3009 }
 0x218   :  { %1309 = vperm.xlu0 %2975, %v3536_v58   ;;  %v3551_v28 = vpop.eup %3011 }
 0x219   :  { %1306 = vperm.xlu1 %2976, %v3539_v29   ;;  %v3555_v4 = vpop.eup %3013 }
 0x21a   :  { %v3557_v35 = vpop.eup %3015 }
 0x21b   :  { %v3561_v19 = vpop.eup %3017 }
 0x21c   :  { %1315 = vperm.xlu0 %2975, %v3543_v30   ;;  %v3563_v43 = vpop.eup %3019 }
 0x21d   :  { %1312 = vperm.xlu1 %2976, %v3545_v23   ;;  %v3567_v45 = vpop.eup %3021 }
 0x21e   :  { %v3569_v14 = vpop.eup %3023 }
 0x220   :  { %1321 = vperm.xlu0 %2975, %v3549_v15  }
 0x221   :  { %1318 = vperm.xlu1 %2976, %v3551_v28  }
 0x224   :  { %1327 = vperm.xlu0 %2975, %v3555_v4  }
 0x225   :  { %1324 = vperm.xlu1 %2976, %v3557_v35  }
 0x228   :  { %1333 = vperm.xlu0 %2975, %v3561_v19  }
 0x229   :  { %1330 = vperm.xlu1 %2976, %v3563_v43  }
 0x22c   :  { %1339 = vperm.xlu0 %2975, %v3567_v45  }
 0x22d   :  { %1336 = vperm.xlu1 %2976, %v3569_v14  }
 0x259   :  { %v1082_v10 = vpop.xlane.xlu0 %1081 }
 0x25a   :  { %v1120_v48 = vrot.slane %v1082_v10, %v3142_v13  ;;  %v1124_v20 = vrot.slane %v1082_v10, %v3288_v49  ;;  %v1128_v21 = vrot.slane %v1082_v10, %v3292_v51  ;;  %v1132_v6 = vrot.slane %v1082_v10, %v3296_v53 }
 0x25b   :  { %v1140_v26 = vrot.slane %v1082_v10, %v3304_v57  ;;  %v1144_v39 = vrot.slane %v1082_v10, %v3308_v60 }
 0x25c   :  { %v1181_v44 = vsub.f32 %v3389_v32, %v1120_v48  ;;  %v1182_v50 = vsub.f32 %v3391_v34, %v1120_v48  ;;  %v1183_v54 = vsub.f32 %v3395_v37, %v1124_v20  ;;  %v1184_v52 = vsub.f32 %v3400_v41, %v1124_v20 }
 0x25d   :  { %v1185_v59 = vsub.f32 %v3398_v40, %v1128_v21  ;;  %v1186_v61 = vsub.f32 %v3406_v47, %v1128_v21  ;;  %v1136_v34 = vrot.slane %v1082_v10, %v3300_v55  ;;  %v1187_v2 = vsub.f32 %v3404_v46, %v1132_v6 }
 0x25e   :  { %v1229_v24 = vmul.f32 1.442695, %v1181_v44  ;;  %v1231_v56 = vmul.f32 1.442695, %v1182_v50  ;;  %v1233_v25 = vmul.f32 1.442695, %v1183_v54  ;;  %v1188_v41 = vsub.f32 %v3412_v1, %v1132_v6 }
 0x25f   :  { %v1235_v32 = vmul.f32 1.442695, %v1184_v52  ;;  %v1237_v37 = vmul.f32 1.442695, %v1185_v59  ;;  %v1239_v3 = vmul.f32 1.442695, %v1186_v61  ;;  %v1189_v40 = vsub.f32 %v3410_v0, %v1136_v34 }
 0x260   :  { %3025 = vpow2.f32 %v1229_v24  ;;  %v1241_v5 = vmul.f32 1.442695, %v1187_v2  ;;  %v1190_v47 = vsub.f32 %v3418_v16, %v1136_v34  ;;  %v1243_v38 = vmul.f32 1.442695, %v1188_v41  ;;  %v3959_v50 = vld [vmem:[#allocation5_spill] sm:$0xff] }
 0x261   :  { %3027 = vpow2.f32 %v1231_v56  ;;  %v1191_v46 = vsub.f32 %v3416_v12, %v1140_v26  ;;  %v1245_v62 = vmul.f32 1.442695, %v1189_v40  ;;  %v1192_v1 = vsub.f32 %v3424_v18, %v1140_v26 }
 0x262   :  { %3029 = vpow2.f32 %v1233_v25  ;;  %v1247_v7 = vmul.f32 1.442695, %v1190_v47  ;;  %v1148_v0 = vrot.slane %v1082_v10, %v3312_v63  ;;  %v1193_v16 = vsub.f32 %v3422_v17, %v1144_v39  ;;  %v3960_v17 = vld [vmem:[#allocation6_spill] sm:$0xff] }
 0x263   :  { %3031 = vpow2.f32 %v1235_v32  ;;  %v1249_v12 = vmul.f32 1.442695, %v1191_v46  ;;  %v1194_v20 = vsub.f32 %v3430_v22, %v1144_v39  ;;  %v1251_v18 = vmul.f32 1.442695, %v1192_v1 }
 0x264   :  { %3033 = vpow2.f32 %v1237_v37  ;;  %v1195_v21 = vsub.f32 %v3959_v50, %v1148_v0  ;;  %v1253_v10 = vmul.f32 1.442695, %v1193_v16  ;;  %v1196_v52 = vsub.f32 %v3960_v17, %v1148_v0 }
 0x265   :  { %3035 = vpow2.f32 %v1239_v3  ;;  %v1255_v24 = vmul.f32 1.442695, %v1194_v20 }
 0x266   :  { %3037 = vpow2.f32 %v1241_v5  ;;  %v1257_v22 = vmul.f32 1.442695, %v1195_v21  ;;  %v1259_v59 = vmul.f32 1.442695, %v1196_v52 }
 0x267   :  { %3039 = vpow2.f32 %v1243_v38 }
 0x268   :  { %3041 = vpow2.f32 %v1245_v62 }
 0x269   :  { %3043 = vpow2.f32 %v1247_v7 }
 0x26a   :  { %3045 = vpow2.f32 %v1249_v12 }
 0x26b   :  { %3047 = vpow2.f32 %v1251_v18 }
 0x26c   :  { %3049 = vpow2.f32 %v1253_v10 }
 0x26d   :  { %v3591_v31 = vpop.eup %3025  ;;  %3051 = vpow2.f32 %v1255_v24 }
 0x26e   :  { %v3594_v9 = vpop.eup %3027  ;;  %1342 = vperm.xlu1 %2976, %v3591_v31   ;;  %3053 = vpow2.f32 %v1257_v22 }
 0x26f   :  { %1345 = vperm.xlu0 %2975, %v3594_v9   ;;  %v3600_v48 = vpop.eup %3029  ;;  %3055 = vpow2.f32 %v1259_v59 }
 0x270   :  { %v3603_v44 = vpop.eup %3031 }
 0x271   :  { %v3608_v54 = vpop.eup %3033 }
 0x272   :  { %1348 = vperm.xlu1 %2976, %v3600_v48   ;;  %v3611_v56 = vpop.eup %3035 }
 0x273   :  { %1351 = vperm.xlu0 %2975, %v3603_v44   ;;  %v3615_v6 = vpop.eup %3037 }
 0x274   :  { %v3617_v25 = vpop.eup %3039 }
 0x275   :  { %v3621_v61 = vpop.eup %3041 }
 0x276   :  { %1354 = vperm.xlu1 %2976, %v3608_v54   ;;  %v3623_v32 = vpop.eup %3043 }
 0x277   :  { %1357 = vperm.xlu0 %2975, %v3611_v56   ;;  %v3627_v34 = vpop.eup %3045 }
 0x278   :  { %v3629_v2 = vpop.eup %3047 }
 0x279   :  { %v3633_v37 = vpop.eup %3049 }
 0x27a   :  { %1360 = vperm.xlu1 %2976, %v3615_v6   ;;  %v3635_v41 = vpop.eup %3051 }
 0x27b   :  { %1363 = vperm.xlu0 %2975, %v3617_v25   ;;  %v3639_v3 = vpop.eup %3053 }
 0x27c   :  { %v3641_v26 = vpop.eup %3055 }
 0x27d   :  { %3961 = vst [vmem:[#allocation5_spill] sm:$0xff] %v3641_v26 }
 0x27e   :  { %1366 = vperm.xlu1 %2976, %v3621_v61  }
 0x27f   :  { %1369 = vperm.xlu0 %2975, %v3623_v32  }
 0x282   :  { %1372 = vperm.xlu1 %2976, %v3627_v34  }
 0x283   :  { %1375 = vperm.xlu0 %2975, %v3629_v2  }
 0x286   :  { %1378 = vperm.xlu1 %2976, %v3633_v37  }
 0x287   :  { %1381 = vperm.xlu0 %2975, %v3635_v41  }
 0x28a   :  { %1384 = vperm.xlu1 %2976, %v3639_v3  }
 0x28b   :  { %1387 = vperm.xlu0 %2975, %v3641_v26   ;;  %v1295_v40 = vpop.permute.xlu0 %1294 }
 0x28c   :  { %v1298_v5 = vpop.permute.xlu1 %1297  ;;  %v1392_v17 = vrot.slane %v1295_v40, %v3132_v8 }
 0x28d   :  { %v1396_v10 = vrot.slane %v1298_v5, %v3138_v11 }
 0x28f   :  { %v1304_v47 = vpop.permute.xlu0 %1303 }
 0x290   :  { %v1301_v38 = vpop.permute.xlu1 %1300  ;;  %v1405_v12 = vrot.slane %v1304_v47, %v3138_v11 }
 0x291   :  { %v1401_v16 = vrot.slane %v1301_v38, %v3132_v8 }
 0x293   :  { %v1310_v39 = vpop.permute.xlu0 %1309  ;;  %v1406_v47 = vsel %vm916_vm1, %v1405_v12, %v1401_v16 }
 0x294   :  { %v1307_v46 = vpop.permute.xlu1 %1306  ;;  %v1414_v50 = vrot.slane %v1310_v39, %v3138_v11 }
 0x295   :  { %v1410_v18 = vrot.slane %v1307_v46, %v3132_v8 }
 0x297   :  { %v1316_v62 = vpop.permute.xlu0 %1315  ;;  %v1415_v26 = vsel %vm916_vm1, %v1414_v50, %v1410_v18 }
 0x298   :  { %v1313_v1 = vpop.permute.xlu1 %1312  ;;  %v1423_v24 = vrot.slane %v1316_v62, %v3138_v11 }
 0x299   :  { %v1419_v52 = vrot.slane %v1313_v1, %v3132_v8  ;;  %v1397_v1 = vsel %vm916_vm1, %v1396_v10, %v1392_v17 }
 0x29b   :  { %v1322_v7 = vpop.permute.xlu0 %1321  ;;  %v1424_v62 = vsel %vm916_vm1, %v1423_v24, %v1419_v52 }
 0x29c   :  { %v1319_v0 = vpop.permute.xlu1 %1318  ;;  %v1432_v59 = vrot.slane %v1322_v7, %v3138_v11  ;;  %v1533_v7 = vsel %vm1053_vm2, %v1406_v47, %v1397_v1 }
 0x29d   :  { %v1428_v22 = vrot.slane %v1319_v0, %v3132_v8  ;;  %v1534_v12 = vsel %vm1055_vm3, %v1415_v26, %v1533_v7 }
 0x29e   :  { %v1535_v18 = vsel %vm1057_vm4, %v1424_v62, %v1534_v12 }
 0x29f   :  { %v1328_v20 = vpop.permute.xlu0 %1327  ;;  %v1433_v16 = vsel %vm916_vm1, %v1432_v59, %v1428_v22 }
 0x2a0   :  { %v1325_v21 = vpop.permute.xlu1 %1324  ;;  %v1441_v46 = vrot.slane %v1328_v20, %v3138_v11  ;;  %v1536_v17 = vsel %vm1059_vm5, %v1433_v16, %v1535_v18 }
 0x2a1   :  { %v1437_v38 = vrot.slane %v1325_v21, %v3132_v8 }
 0x2a3   :  { %v1334_v39 = vpop.permute.xlu0 %1333  ;;  %v1442_v20 = vsel %vm916_vm1, %v1441_v46, %v1437_v38 }
 0x2a4   :  { %v1331_v5 = vpop.permute.xlu1 %1330  ;;  %v1450_v40 = vrot.slane %v1334_v39, %v3138_v11  ;;  %v1537_v24 = vsel %vm1061_vm6, %v1442_v20, %v1536_v17 }
 0x2a5   :  { %v1446_v0 = vrot.slane %v1331_v5, %v3132_v8 }
 0x2a7   :  { %v1340_v21 = vpop.permute.xlu0 %1339  ;;  %v1451_v50 = vsel %vm916_vm1, %v1450_v40, %v1446_v0 }
 0x2a8   :  { %v1337_v39 = vpop.permute.xlu1 %1336  ;;  %v1459_v10 = vrot.slane %v1340_v21, %v3138_v11  ;;  %v1538_v26 = vsel %vm1063_vm7, %v1451_v50, %v1537_v24 }
 0x2a9   :  { %v1455_v52 = vrot.slane %v1337_v39, %v3132_v8 }
 0x2ab   :  { %v1460_v22 = vsel %vm916_vm1, %v1459_v10, %v1455_v52 }
 0x2ac   :  { %v1539_v59 = vsel %vm1065_vm8, %v1460_v22, %v1538_v26 }
 0x2ad   :  { %v1549_v47 = vsel %vm1076_vm9, %v1539_v59, 0.0 }
 0x2ae   :  { %1550 = vadd.xlane.f32.xlu1 %v1549_v47 }
 0x2e9   :  { %v1343_v38 = vpop.permute.xlu1 %1342 }
 0x2ea   :  { %v1346_v46 = vpop.permute.xlu0 %1345  ;;  %v1464_v17 = vrot.slane %v1343_v38, %v3132_v8 }
 0x2eb   :  { %v1468_v52 = vrot.slane %v1346_v46, %v3138_v11 }
 0x2ed   :  { %v1349_v5 = vpop.permute.xlu1 %1348 }
 0x2ee   :  { %v1352_v40 = vpop.permute.xlu0 %1351  ;;  %v1473_v20 = vrot.slane %v1349_v5, %v3132_v8 }
 0x2ef   :  { %v1477_v21 = vrot.slane %v1352_v40, %v3138_v11 }
 0x2f1   :  { %v1355_v1 = vpop.permute.xlu1 %1354  ;;  %v1478_v47 = vsel %vm916_vm1, %v1477_v21, %v1473_v20 }
 0x2f2   :  { %v1358_v62 = vpop.permute.xlu0 %1357  ;;  %v1482_v50 = vrot.slane %v1355_v1, %v3132_v8 }
 0x2f3   :  { %v1486_v39 = vrot.slane %v1358_v62, %v3138_v11 }
 0x2f5   :  { %v1361_v0 = vpop.permute.xlu1 %1360  ;;  %v1487_v62 = vsel %vm916_vm1, %v1486_v39, %v1482_v50 }
 0x2f6   :  { %v1364_v7 = vpop.permute.xlu0 %1363  ;;  %v1491_v24 = vrot.slane %v1361_v0, %v3132_v8  ;;  %v1469_v0 = vsel %vm916_vm1, %v1468_v52, %v1464_v17 }
 0x2f7   :  { %v1495_v22 = vrot.slane %v1364_v7, %v3138_v11 }
 0x2f9   :  { %v1367_v16 = vpop.permute.xlu1 %1366  ;;  %v1496_v7 = vsel %vm916_vm1, %v1495_v22, %v1491_v24 }
 0x2fa   :  { %v1370_v12 = vpop.permute.xlu0 %1369  ;;  %v1500_v26 = vrot.slane %v1367_v16, %v3132_v8 }
 0x2fb   :  { %v1504_v59 = vrot.slane %v1370_v12, %v3138_v11  ;;  %v1540_v12 = vsel %vm1053_vm2, %v1478_v47, %v1469_v0 }
 0x2fc   :  { %v1541_v21 = vsel %vm1055_vm3, %v1487_v62, %v1540_v12 }
 0x2fd   :  { %v1373_v18 = vpop.permute.xlu1 %1372  ;;  %v1505_v20 = vsel %vm916_vm1, %v1504_v59, %v1500_v26  ;;  %v1542_v50 = vsel %vm1057_vm4, %v1496_v7, %v1541_v21 }
 0x2fe   :  { %v1376_v10 = vpop.permute.xlu0 %1375  ;;  %v1509_v5 = vrot.slane %v1373_v18, %v3132_v8  ;;  %v1543_v52 = vsel %vm1059_vm5, %v1505_v20, %v1542_v50 }
 0x2ff   :  { %v1513_v40 = vrot.slane %v1376_v10, %v3138_v11 }
 0x301   :  { %v1379_v1 = vpop.permute.xlu1 %1378  ;;  %v1514_v18 = vsel %vm916_vm1, %v1513_v40, %v1509_v5 }
 0x302   :  { %v1518_v38 = vrot.slane %v1379_v1, %v3132_v8  ;;  %v1382_v46 = vpop.permute.xlu0 %1381  ;;  %v1544_v22 = vsel %vm1061_vm6, %v1514_v18, %v1543_v52 }
 0x303   :  { %v1522_v16 = vrot.slane %v1382_v46, %v3138_v11 }
 0x305   :  { %v1385_v10 = vpop.permute.xlu1 %1384  ;;  %v1523_v39 = vsel %vm916_vm1, %v1522_v16, %v1518_v38 }
 0x306   :  { %v1527_v1 = vrot.slane %v1385_v10, %v3132_v8  ;;  %v1388_v17 = vpop.permute.xlu0 %1387  ;;  %v1545_v59 = vsel %vm1063_vm7, %v1523_v39, %v1544_v22 }
 0x307   :  { %v1531_v24 = vrot.slane %v1388_v17, %v3138_v11 }
 0x309   :  { %v1532_v26 = vsel %vm916_vm1, %v1531_v24, %v1527_v1 }
 0x30a   :  { %v1546_v47 = vsel %vm1065_vm8, %v1532_v26, %v1545_v59  ;;  %v3101_v26 = vmov 0.0  }
 0x30b   :  { %v1552_v5 = vsel %vm1076_vm9, %v1546_v47, 0.0  ;;  %2872 = vmatprep.subr.bf16.mxu0 %v3101_v26  ;;  %2878 = vmatprep.subr.bf16.mxu1 %v3101_v26 }
 0x30c   :  { %1553 = vadd.xlane.f32.xlu0 %v1552_v5  ;;  %2874 = vmatprep.mubr.msk.bf16.mxu0 %vm3102_vm11, %v3101_v26 }
 0x30d   :  { %2880 = vmatprep.mubr.msk.bf16.mxu1 %vm3102_vm11, %v3101_v26 }
 0x337   :  { %v1551_v40 = vpop.xlane.xlu1 %1550 }
 0x338   :  { %3057 = vrcp.f32 %v1551_v40 }
 0x345   :  { %v3058_v62 = vpop.eup %3057 }
 0x346   :  { %v1557_v38 = vmul.f32 %v3058_v62, %v1551_v40 }
 0x348   :  { %v1559_v46 = vsub.f32 2.0, %v1557_v38 }
 0x34a   :  { %v1561_v0 = vmul.f32 %v3058_v62, %v1559_v46 }
 0x34c   :  { %v1568_v7 = vrot.slane %v1561_v0, %v3142_v13  ;;  %v1572_v16 = vrot.slane %v1561_v0, %v3288_v49  ;;  %v1576_v12 = vrot.slane %v1561_v0, %v3292_v51  ;;  %v1580_v1 = vrot.slane %v1561_v0, %v3296_v53 }
 0x34d   :  { %v1588_v62 = vrot.slane %v1561_v0, %v3304_v57 }
 0x34e   :  { %v1645_v20 = vmul.f32 %v3519_v33, %v1568_v7  ;;  %v1646_v21 = vmul.f32 %v3522_v36, %v1568_v7  ;;  %v1647_v18 = vmul.f32 %v3531_v27, %v1572_v16  ;;  %v1648_v10 = vmul.f32 %v3528_v42, %v1572_v16 }
 0x34f   :  { %v1649_v39 = vmul.f32 %v3539_v29, %v1576_v12  ;;  %v1650_v22 = vmul.f32 %v3536_v58, %v1576_v12  ;;  %v1651_v33 = vmul.f32 %v3545_v23, %v1580_v1  ;;  %v1584_v36 = vrot.slane %v1561_v0, %v3300_v55  ;;  %v3061_v58 = vld [vmem:[%s3952_s2] sm:$0x3f]   ;;  %v3062_v23 = vld [vmem:[%s3952_s2 + $0x8] sm:$0x3f]  }
 0x350   :  { %v1677_v50 = vpack.c.bf16 %v1646_v21, %v1645_v20  ;;  %v1678_v24 = vpack.c.bf16 %v1648_v10, %v1647_v18  ;;  %v1652_v59 = vmul.f32 %v3543_v30, %v1580_v1  ;;  %v1717_v47 = vsel %vm1715_vm10, %v3061_v58, 0 }
 0x351   :  { %v1679_v29 = vpack.c.bf16 %v1650_v22, %v1649_v39  ;;  %v1782_v5 = vsel %vm1715_vm10, %v3062_v23, 0  ;;  %v1653_v40 = vmul.f32 %v3551_v28, %v1584_v36  ;;  %2873 = vmatpush3.bf16.msra.mxu0 %v1717_v47  ;;  %v1654_v7 = vmul.f32 %v3549_v15, %v1584_v36 }
 0x352   :  { %v1695_v17 = vunpack.c.h.b16 %v1677_v50  ;;  %v1694_v52 = vunpack.c.l.b16 %v1677_v50  ;;  %v1760_v42 = vunpack.c.l.b16 %v1678_v24  ;;  %v1761_v27 = vunpack.c.h.b16 %v1678_v24  ;;  %2879 = vmatpush3.bf16.msra.mxu1 %v1782_v5  ;;  %2884 = vmatprep.subr.bf16.mxu0 %v3101_v26 }
 0x353   :  { %v1825_v30 = vunpack.c.l.b16 %v1679_v29  ;;  %v1826_v38 = vunpack.c.h.b16 %v1679_v29  ;;  %v1680_v46 = vpack.c.bf16 %v1652_v59, %v1651_v33  ;;  %2890 = vmatprep.subr.bf16.mxu1 %v3101_v26  ;;  %v1655_v28 = vmul.f32 %v3557_v35, %v1588_v62 }
 0x354   :  { %1700 = vperm.xlu1 %2976, %v1695_v17   ;;  %1697 = vperm.xlu0 %2975, %v1694_v52   ;;  %v1656_v16 = vmul.f32 %v3555_v4, %v1588_v62  ;;  %v1681_v21 = vpack.c.bf16 %v1654_v7, %v1653_v40  ;;  %v1592_v18 = vrot.slane %v1561_v0, %v3308_v60 }
 0x355   :  { %v1890_v12 = vunpack.c.l.b16 %v1680_v46  ;;  %v1891_v20 = vunpack.c.h.b16 %v1680_v46  ;;  %v1596_v10 = vrot.slane %v1561_v0, %v3312_v63 }
 0x356   :  { %v1682_v15 = vpack.c.bf16 %v1656_v16, %v1655_v28  ;;  %v1955_v50 = vunpack.c.l.b16 %v1681_v21  ;;  %v1956_v39 = vunpack.c.h.b16 %v1681_v21  ;;  %v1657_v1 = vmul.f32 %v3563_v43, %v1592_v18 }
 0x357   :  { %v1658_v17 = vmul.f32 %v3561_v19, %v1592_v18  ;;  %v1659_v4 = vmul.f32 %v3569_v14, %v1596_v10  ;;  %v1660_v22 = vmul.f32 %v3567_v45, %v1596_v10 }
 0x358   :  { %1763 = vperm.xlu1 %2976, %v1760_v42   ;;  %1766 = vperm.xlu0 %2975, %v1761_v27   ;;  %v2020_v35 = vunpack.c.l.b16 %v1682_v15  ;;  %v2021_v52 = vunpack.c.h.b16 %v1682_v15 }
 0x359   :  { %v1683_v24 = vpack.c.bf16 %v1658_v17, %v1657_v1  ;;  %v1684_v0 = vpack.c.bf16 %v1660_v22, %v1659_v4 }
 0x35b   :  { %v2085_v33 = vunpack.c.l.b16 %v1683_v24  ;;  %v2086_v36 = vunpack.c.h.b16 %v1683_v24  ;;  %v2150_v42 = vunpack.c.l.b16 %v1684_v0  ;;  %v2151_v43 = vunpack.c.h.b16 %v1684_v0 }
 0x35c   :  { %1828 = vperm.xlu1 %2976, %v1825_v30   ;;  %1831 = vperm.xlu0 %2975, %v1826_v38  }
 0x360   :  { %1893 = vperm.xlu1 %2976, %v1890_v12   ;;  %1896 = vperm.xlu0 %2975, %v1891_v20  }
 0x364   :  { %1958 = vperm.xlu1 %2976, %v1955_v50   ;;  %1961 = vperm.xlu0 %2975, %v1956_v39  }
 0x368   :  { %2023 = vperm.xlu1 %2976, %v2020_v35   ;;  %2026 = vperm.xlu0 %2975, %v2021_v52   ;;  %v3962_v35 = vld [vmem:[#allocation5_spill] sm:$0xff] }
 0x36c   :  { %2088 = vperm.xlu1 %2976, %v2085_v33   ;;  %2091 = vperm.xlu0 %2975, %v2086_v36  }
 0x370   :  { %2153 = vperm.xlu1 %2976, %v2150_v42   ;;  %2156 = vperm.xlu0 %2975, %v2151_v43  }
 0x395   :  { %v1554_v19 = vpop.xlane.xlu0 %1553 }
 0x396   :  { %3059 = vrcp.f32 %v1554_v19 }
 0x3a3   :  { %v3060_v27 = vpop.eup %3059 }
 0x3a4   :  { %v1558_v14 = vmul.f32 %v3060_v27, %v1554_v19 }
 0x3a6   :  { %v1560_v29 = vsub.f32 2.0, %v1558_v14 }
 0x3a8   :  { %v1562_v59 = vmul.f32 %v3060_v27, %v1560_v29  ;;  %v3063_v27 = vld [vmem:[%s3952_s2 + $0x10] sm:$0x3f]  }
 0x3a9   :  { %v1847_v14 = vsel %vm1715_vm10, %v3063_v27, 0 }
 0x3aa   :  { %v1600_v58 = vrot.slane %v1562_v59, %v3142_v13  ;;  %v1604_v45 = vrot.slane %v1562_v59, %v3288_v49  ;;  %v1608_v47 = vrot.slane %v1562_v59, %v3292_v51  ;;  %v1612_v46 = vrot.slane %v1562_v59, %v3296_v53 }
 0x3ab   :  { %v1624_v10 = vrot.slane %v1562_v59, %v3308_v60 }
 0x3ac   :  { %v1661_v23 = vmul.f32 %v3591_v31, %v1600_v58  ;;  %v1662_v5 = vmul.f32 %v3594_v9, %v1600_v58  ;;  %v1663_v40 = vmul.f32 %v3600_v48, %v1604_v45  ;;  %v1664_v62 = vmul.f32 %v3603_v44, %v1604_v45 }
 0x3ad   :  { %v1665_v38 = vmul.f32 %v3608_v54, %v1608_v47  ;;  %v1666_v49 = vmul.f32 %v3611_v56, %v1608_v47  ;;  %v1667_v51 = vmul.f32 %v3615_v6, %v1612_v46  ;;  %v1616_v31 = vrot.slane %v1562_v59, %v3300_v55 }
 0x3ae   :  { %v1685_v30 = vpack.c.bf16 %v1662_v5, %v1661_v23  ;;  %v1686_v13 = vpack.c.bf16 %v1664_v62, %v1663_v40  ;;  %v1668_v44 = vmul.f32 %v3617_v25, %v1612_v46  ;;  %v1620_v54 = vrot.slane %v1562_v59, %v3304_v57  ;;  %v3064_v5 = vld [vmem:[%s3952_s2 + $0x18] sm:$0x3f]  }
 0x3af   :  { %v1687_v16 = vpack.c.bf16 %v1666_v49, %v1665_v38  ;;  %v1669_v53 = vmul.f32 %v3621_v61, %v1616_v31  ;;  %v1670_v21 = vmul.f32 %v3623_v32, %v1616_v31  ;;  %v1628_v57 = vrot.slane %v1562_v59, %v3312_v63 }
 0x3b0   :  { %v2216_v7 = vunpack.c.h.b16 %v1685_v30  ;;  %v2215_v28 = vunpack.c.l.b16 %v1685_v30  ;;  %v2281_v9 = vunpack.c.h.b16 %v1686_v13  ;;  %v2280_v48 = vunpack.c.l.b16 %v1686_v13  ;;  %v3065_v13 = vld [vmem:[%s3952_s2 + $0x20] sm:$0x3f]  }
 0x3b1   :  { %v2346_v12 = vunpack.c.h.b16 %v1687_v16  ;;  %v2345_v20 = vunpack.c.l.b16 %v1687_v16  ;;  %v1688_v56 = vpack.c.bf16 %v1668_v44, %v1667_v51  ;;  %v1671_v55 = vmul.f32 %v3627_v34, %v1620_v54 }
 0x3b2   :  { %2221 = vperm.xlu0 %2975, %v2216_v7   ;;  %2218 = vperm.xlu1 %2976, %v2215_v28   ;;  %v1672_v6 = vmul.f32 %v3629_v2, %v1620_v54  ;;  %v1689_v25 = vpack.c.bf16 %v1670_v21, %v1669_v53  ;;  %v1673_v32 = vmul.f32 %v3633_v37, %v1624_v10  ;;  %v1912_v40 = vsel %vm1715_vm10, %v3064_v5, 0  ;;  %v3066_v53 = vld [vmem:[%s3952_s2 + $0x28] sm:$0x3f]  }
 0x3b3   :  { %v2411_v18 = vunpack.c.h.b16 %v1688_v56  ;;  %v2410_v15 = vunpack.c.l.b16 %v1688_v56  ;;  %v1674_v1 = vmul.f32 %v3635_v41, %v1624_v10  ;;  %v1675_v34 = vmul.f32 %v3639_v3, %v1628_v57 }
 0x3b4   :  { %v1690_v61 = vpack.c.bf16 %v1672_v6, %v1671_v55  ;;  %v2476_v50 = vunpack.c.h.b16 %v1689_v25  ;;  %v2475_v39 = vunpack.c.l.b16 %v1689_v25  ;;  %v1676_v60 = vmul.f32 %v3962_v35, %v1628_v57 }
 0x3b5   :  { %v1691_v4 = vpack.c.bf16 %v1674_v1, %v1673_v32  ;;  %v1977_v49 = vsel %vm1715_vm10, %v3065_v13, 0  ;;  %v2042_v54 = vsel %vm1715_vm10, %v3066_v53, 0  ;;  %v3068_v32 = vld [vmem:[%s3952_s2 + $0x38] sm:$0x3f]  }
 0x3b6   :  { %2286 = vperm.xlu0 %2975, %v2281_v9   ;;  %2283 = vperm.xlu1 %2976, %v2280_v48   ;;  %v2541_v2 = vunpack.c.h.b16 %v1690_v61  ;;  %v2540_v17 = vunpack.c.l.b16 %v1690_v61  ;;  %v1692_v63 = vpack.c.bf16 %v1676_v60, %v1675_v34  ;;  %v2172_v1 = vsel %vm1715_vm10, %v3068_v32, 0 }
 0x3b7   :  { %v2606_v52 = vunpack.c.h.b16 %v1691_v4  ;;  %v2605_v24 = vunpack.c.l.b16 %v1691_v4 }
 0x3b8   :  { %v2671_v22 = vunpack.c.h.b16 %v1692_v63  ;;  %v2670_v37 = vunpack.c.l.b16 %v1692_v63 }
 0x3ba   :  { %2351 = vperm.xlu0 %2975, %v2346_v12   ;;  %2348 = vperm.xlu1 %2976, %v2345_v20  }
 0x3be   :  { %2416 = vperm.xlu0 %2975, %v2411_v18   ;;  %2413 = vperm.xlu1 %2976, %v2410_v15   ;;  %v3067_v18 = vld [vmem:[%s3952_s2 + $0x30] sm:$0x3f]  }
 0x3bf   :  { %v2107_v15 = vsel %vm1715_vm10, %v3067_v18, 0 }
 0x3c2   :  { %2481 = vperm.xlu0 %2975, %v2476_v50   ;;  %2478 = vperm.xlu1 %2976, %v2475_v39  }
 0x3c6   :  { %2546 = vperm.xlu0 %2975, %v2541_v2   ;;  %2543 = vperm.xlu1 %2976, %v2540_v17  }
 0x3ca   :  { %2611 = vperm.xlu0 %2975, %v2606_v52   ;;  %2608 = vperm.xlu1 %2976, %v2605_v24   ;;  %v3069_v52 = vld [vmem:[%s3952_s2 + $0x40] sm:$0x3f]  }
 0x3cb   :  { %v2237_v24 = vsel %vm1715_vm10, %v3069_v52, 0 }
 0x3ce   :  { %2676 = vperm.xlu0 %2975, %v2671_v22   ;;  %2673 = vperm.xlu1 %2976, %v2670_v37  }
 0x3cf   :  { %v1701_v41 = vpop.permute.xlu1 %1700  ;;  %v1698_v33 = vpop.permute.xlu0 %1697 }
 0x3d0   :  { %v1709_v3 = vrot.slane %v1701_v41, %v3138_v11  ;;  %v1705_v36 = vrot.slane %v1698_v33, %v3132_v8  ;;  %v3070_v33 = vld [vmem:[%s3952_s2 + $0x48] sm:$0x3f]  }
 0x3d2   :  { %v1710_v0 = vsel %vm916_vm1, %v1709_v3, %v1705_v36  ;;  %v2302_v3 = vsel %vm1715_vm10, %v3070_v33, 0 }
 0x3d3   :  { %v1711_v42 = vpack.c.b16 %v1710_v0, %v1710_v0  ;;  %v1764_v43 = vpop.permute.xlu1 %1763  ;;  %v1767_v19 = vpop.permute.xlu0 %1766 }
 0x3d4   :  { %v1771_v29 = vrot.slane %v1764_v43, %v3132_v8  ;;  %v1775_v59 = vrot.slane %v1767_v19, %v3138_v11 }
 0x3d5   :  { %2875 = vmatmul.mubr.msk.bf16.vlgmr.msra.gmra.mxu0 %vm1076_vm9, %v1711_v42 }
 0x3d6   :  { %v1776_v58 = vsel %vm916_vm1, %v1775_v59, %v1771_v29  ;;  %2885 = vmatpush3.bf16.msra.mxu0 %v1847_v14  ;;  %2886 = vmatprep.mubr.msk.bf16.mxu0 %vm3102_vm11, %v3101_v26  ;;  %v3071_v59 = vld [vmem:[%s3952_s2 + $0x50] sm:$0x3f]  }
 0x3d7   :  { %v1777_v45 = vpack.c.b16 %v1776_v58, %v1776_v58  ;;  %v1829_v47 = vpop.permute.xlu1 %1828  ;;  %v1832_v23 = vpop.permute.xlu0 %1831  ;;  %2896 = vmatprep.subr.bf16.mxu0 %v3101_v26  ;;  %v2367_v58 = vsel %vm1715_vm10, %v3071_v59, 0 }
 0x3d8   :  { %v1836_v62 = vrot.slane %v1829_v47, %v3132_v8  ;;  %v1840_v30 = vrot.slane %v1832_v23, %v3138_v11 }
 0x3d9   :  { %2881 = vmatmul.mubr.msk.bf16.vlgmr.msra.gmra.mxu1 %vm1076_vm9, %v1777_v45 }
 0x3da   :  { %v1841_v38 = vsel %vm916_vm1, %v1840_v30, %v1836_v62  ;;  %2891 = vmatpush3.bf16.msra.mxu1 %v1912_v40  ;;  %2892 = vmatprep.mubr.msk.bf16.mxu1 %vm3102_vm11, %v3101_v26  ;;  %v3072_v30 = vld [vmem:[%s3952_s2 + $0x58] sm:$0x3f]  }
 0x3db   :  { %v1842_v46 = vpack.c.b16 %v1841_v38, %v1841_v38  ;;  %v1894_v7 = vpop.permute.xlu1 %1893  ;;  %v1897_v28 = vpop.permute.xlu0 %1896  ;;  %2902 = vmatprep.subr.bf16.mxu1 %v3101_v26  ;;  %v2432_v38 = vsel %vm1715_vm10, %v3072_v30, 0 }
 0x3dc   :  { %v1901_v51 = vrot.slane %v1894_v7, %v3132_v8  ;;  %v1905_v31 = vrot.slane %v1897_v28, %v3138_v11 }
 0x3dd   :  { %2887 = vmatmul.mubr.msk.bf16.vlgmr.msra.gmra.mxu0 %vm1076_vm9, %v1842_v46 }
 0x3de   :  { %v1906_v9 = vsel %vm916_vm1, %v1905_v31, %v1901_v51  ;;  %2897 = vmatpush3.bf16.msra.mxu0 %v1977_v49  ;;  %2898 = vmatprep.mubr.msk.bf16.mxu0 %vm3102_vm11, %v3101_v26  ;;  %v3073_v31 = vld [vmem:[%s3952_s2 + $0x60] sm:$0x3f]  }
 0x3df   :  { %v1907_v48 = vpack.c.b16 %v1906_v9, %v1906_v9  ;;  %v1959_v16 = vpop.permute.xlu1 %1958  ;;  %v1962_v44 = vpop.permute.xlu0 %1961  ;;  %2908 = vmatprep.subr.bf16.mxu0 %v3101_v26  ;;  %v2497_v9 = vsel %vm1715_vm10, %v3073_v31, 0 }
 0x3e0   :  { %v1966_v12 = vrot.slane %v1959_v16, %v3132_v8  ;;  %v1970_v20 = vrot.slane %v1962_v44, %v3138_v11 }
 0x3e1   :  { %2893 = vmatmul.mubr.msk.bf16.vlgmr.msra.gmra.mxu1 %vm1076_vm9, %v1907_v48 }
 0x3e2   :  { %v1971_v56 = vsel %vm916_vm1, %v1970_v20, %v1966_v12  ;;  %2903 = vmatpush3.bf16.msra.mxu1 %v2042_v54  ;;  %2904 = vmatprep.mubr.msk.bf16.mxu1 %vm3102_vm11, %v3101_v26  ;;  %v3074_v20 = vld [vmem:[%s3952_s2 + $0x68] sm:$0x3f]  }
 0x3e3   :  { %v1972_v21 = vpack.c.b16 %v1971_v56, %v1971_v56  ;;  %v2024_v55 = vpop.permute.xlu1 %2023  ;;  %v2027_v6 = vpop.permute.xlu0 %2026  ;;  %2914 = vmatprep.subr.bf16.mxu1 %v3101_v26  ;;  %v2562_v56 = vsel %vm1715_vm10, %v3074_v20, 0 }
 0x3e4   :  { %v2031_v25 = vrot.slane %v2024_v55, %v3132_v8  ;;  %v2035_v10 = vrot.slane %v2027_v6, %v3138_v11 }
 0x3e5   :  { %2899 = vmatmul.mubr.msk.bf16.vlgmr.msra.gmra.mxu0 %vm1076_vm9, %v1972_v21 }
 0x3e6   :  { %v2036_v61 = vsel %vm916_vm1, %v2035_v10, %v2031_v25  ;;  %2909 = vmatpush3.bf16.msra.mxu0 %v2107_v15  ;;  %2910 = vmatprep.mubr.msk.bf16.mxu0 %vm3102_vm11, %v3101_v26  ;;  %v3075_v10 = vld [vmem:[%s3952_s2 + $0x70] sm:$0x3f]  }
 0x3e7   :  { %v2037_v57 = vpack.c.b16 %v2036_v61, %v2036_v61  ;;  %v2089_v50 = vpop.permute.xlu1 %2088  ;;  %v2092_v39 = vpop.permute.xlu0 %2091  ;;  %2920 = vmatprep.subr.bf16.mxu0 %v3101_v26  ;;  %v2627_v61 = vsel %vm1715_vm10, %v3075_v10, 0 }
 0x3e8   :  { %v2096_v34 = vrot.slane %v2089_v50, %v3132_v8  ;;  %v2100_v2 = vrot.slane %v2092_v39, %v3138_v11 }
 0x3e9   :  { %2905 = vmatmul.mubr.msk.bf16.vlgmr.msra.gmra.mxu1 %vm1076_vm9, %v2037_v57 }
 0x3ea   :  { %v2101_v17 = vsel %vm916_vm1, %v2100_v2, %v2096_v34  ;;  %2915 = vmatpush3.bf16.msra.mxu1 %v2172_v1  ;;  %2916 = vmatprep.mubr.msk.bf16.mxu1 %vm3102_vm11, %v3101_v26  ;;  %v3076_v2 = vld [vmem:[%s3952_s2 + $0x78] sm:$0x3f]   ;;  %s3103_s2 = smov [#allocation2]  }
 0x3eb   :  { %v2102_v4 = vpack.c.b16 %v2101_v17, %v2101_v17  ;;  %v2154_v35 = vpop.permute.xlu1 %2153  ;;  %v2157_v60 = vpop.permute.xlu0 %2156  ;;  %2926 = vmatprep.subr.bf16.mxu1 %v3101_v26  ;;  %v2692_v17 = vsel %vm1715_vm10, %v3076_v2, 0  ;;  %s2787_s26 = sshll.u32 %s3103_s2, 4  ;;  %s2788_s26 = int_to_ptr.vmem [resolvable:$true] %s2787_s26 }
 0x3ec   :  { %v2161_v63 = vrot.slane %v2154_v35, %v3132_v8  ;;  %v2165_v22 = vrot.slane %v2157_v60, %v3138_v11  ;;  %s3077_s27 = scalar_lea.vmem %s2788_s26, 256  ;;  %p3082_p1 = scmp.lt.s32.totalorder %s2788_s26, %s2788_s26 }
 0x3ed   :  { %2911 = vmatmul.mubr.msk.bf16.vlgmr.msra.gmra.mxu0 %vm1076_vm9, %v2102_v4  ;;  %p3078_p0 = scmp.ne.s32.totalorder %s2788_s26, %s3077_s27  ;;  %p3083_p2 = scmp.lt.s32.totalorder %s3077_s27, %s3077_s27 }
 0x3ee   :  { %v2166_v37 = vsel %vm916_vm1, %v2165_v22, %v2161_v63  ;;  %2921 = vmatpush3.bf16.msra.mxu0 %v2237_v24  ;;  %2922 = vmatprep.mubr.msk.bf16.mxu0 %vm3102_vm11, %v3101_v26 }
 0x3ef   :  { %v2167_v41 = vpack.c.b16 %v2166_v37, %v2166_v37  ;;  %2932 = vmatprep.subr.bf16.mxu0 %v3101_v26  ;;  %p3084_p3 = por %p3083_p2, %p3082_p1 }
 0x3f1   :  { %2917 = vmatmul.mubr.msk.bf16.vlgmr.msra.gmra.mxu1 %vm1076_vm9, %v2167_v41  ;;  %p3085_p4 = pnand %p3084_p3, %p3078_p0 }
 0x3f2   :  { %2927 = vmatpush3.bf16.msra.mxu1 %v2302_v3  ;;  %2928 = vmatprep.mubr.msk.bf16.mxu1 %vm3102_vm11, %v3101_v26 }
 0x3f3   :  { %2938 = vmatprep.subr.bf16.mxu1 %v3101_v26 }
 0x42d   :  { %v2219_v36 = vpop.permute.xlu1 %2218  ;;  %v2222_v0 = vpop.permute.xlu0 %2221 }
 0x42e   :  { %v2226_v42 = vrot.slane %v2219_v36, %v3132_v8  ;;  %v2230_v43 = vrot.slane %v2222_v0, %v3138_v11 }
 0x430   :  { %v2231_v19 = vsel %vm916_vm1, %v2230_v43, %v2226_v42 }
 0x431   :  { %v2232_v27 = vpack.c.b16 %v2231_v19, %v2231_v19  ;;  %v2284_v14 = vpop.permute.xlu1 %2283  ;;  %v2287_v29 = vpop.permute.xlu0 %2286 }
 0x432   :  { %v2291_v45 = vrot.slane %v2284_v14, %v3132_v8  ;;  %v2295_v47 = vrot.slane %v2287_v29, %v3138_v11 }
 0x433   :  { %2923 = vmatmul.mubr.msk.bf16.vlgmr.msra.gmra.mxu0 %vm1076_vm9, %v2232_v27 }
 0x434   :  { %v2296_v23 = vsel %vm916_vm1, %v2295_v47, %v2291_v45  ;;  %2933 = vmatpush3.bf16.msra.mxu0 %v2367_v58  ;;  %2934 = vmatprep.mubr.msk.bf16.mxu0 %vm3102_vm11, %v3101_v26 }
 0x435   :  { %v2297_v5 = vpack.c.b16 %v2296_v23, %v2296_v23  ;;  %v2349_v40 = vpop.permute.xlu1 %2348  ;;  %v2352_v62 = vpop.permute.xlu0 %2351  ;;  %2944 = vmatprep.subr.bf16.mxu0 %v3101_v26 }
 0x436   :  { %v2356_v46 = vrot.slane %v2349_v40, %v3132_v8  ;;  %v2360_v7 = vrot.slane %v2352_v62, %v3138_v11 }
 0x437   :  { %2929 = vmatmul.mubr.msk.bf16.vlgmr.msra.gmra.mxu1 %vm1076_vm9, %v2297_v5 }
 0x438   :  { %v2361_v28 = vsel %vm916_vm1, %v2360_v7, %v2356_v46  ;;  %2939 = vmatpush3.bf16.msra.mxu1 %v2432_v38  ;;  %2940 = vmatprep.mubr.msk.bf16.mxu1 %vm3102_vm11, %v3101_v26 }
 0x439   :  { %v2362_v13 = vpack.c.b16 %v2361_v28, %v2361_v28  ;;  %v2414_v49 = vpop.permute.xlu1 %2413  ;;  %v2417_v51 = vpop.permute.xlu0 %2416  ;;  %2950 = vmatprep.subr.bf16.mxu1 %v3101_v26 }
 0x43a   :  { %v2421_v48 = vrot.slane %v2414_v49, %v3132_v8  ;;  %v2425_v16 = vrot.slane %v2417_v51, %v3138_v11 }
 0x43b   :  { %2935 = vmatmul.mubr.msk.bf16.vlgmr.msra.gmra.mxu0 %vm1076_vm9, %v2362_v13 }
 0x43c   :  { %v2426_v44 = vsel %vm916_vm1, %v2425_v16, %v2421_v48  ;;  %2945 = vmatpush3.bf16.msra.mxu0 %v2497_v9  ;;  %2946 = vmatprep.mubr.msk.bf16.mxu0 %vm3102_vm11, %v3101_v26 }
 0x43d   :  { %v2427_v53 = vpack.c.b16 %v2426_v44, %v2426_v44  ;;  %v2479_v54 = vpop.permute.xlu1 %2478  ;;  %v2482_v12 = vpop.permute.xlu0 %2481  ;;  %2956 = vmatprep.subr.bf16.mxu0 %v3101_v26 }
 0x43e   :  { %v2486_v21 = vrot.slane %v2479_v54, %v3132_v8  ;;  %v2490_v55 = vrot.slane %v2482_v12, %v3138_v11 }
 0x43f   :  { %2941 = vmatmul.mubr.msk.bf16.vlgmr.msra.gmra.mxu1 %vm1076_vm9, %v2427_v53 }
 0x440   :  { %v2491_v6 = vsel %vm916_vm1, %v2490_v55, %v2486_v21  ;;  %2951 = vmatpush3.bf16.msra.mxu1 %v2562_v56  ;;  %2952 = vmatprep.mubr.msk.bf16.mxu1 %vm3102_vm11, %v3101_v26 }
 0x441   :  { %v2492_v18 = vpack.c.b16 %v2491_v6, %v2491_v6  ;;  %v2544_v15 = vpop.permute.xlu1 %2543  ;;  %v2547_v25 = vpop.permute.xlu0 %2546  ;;  %2962 = vmatprep.subr.bf16.mxu1 %v3101_v26 }
 0x442   :  { %v2551_v57 = vrot.slane %v2544_v15, %v3132_v8  ;;  %v2555_v50 = vrot.slane %v2547_v25, %v3138_v11 }
 0x443   :  { %2947 = vmatmul.mubr.msk.bf16.vlgmr.msra.gmra.mxu0 %vm1076_vm9, %v2492_v18 }
 0x444   :  { %v2556_v39 = vsel %vm916_vm1, %v2555_v50, %v2551_v57  ;;  %2957 = vmatpush3.bf16.msra.mxu0 %v2627_v61  ;;  %2958 = vmatprep.mubr.msk.bf16.mxu0 %vm3102_vm11, %v3101_v26 }
 0x445   :  { %v2557_v32 = vpack.c.b16 %v2556_v39, %v2556_v39  ;;  %v2609_v1 = vpop.permute.xlu1 %2608  ;;  %v2612_v34 = vpop.permute.xlu0 %2611 }
 0x446   :  { %v2616_v4 = vrot.slane %v2609_v1, %v3132_v8  ;;  %v2620_v35 = vrot.slane %v2612_v34, %v3138_v11 }
 0x447   :  { %2953 = vmatmul.mubr.msk.bf16.vlgmr.msra.gmra.mxu1 %vm1076_vm9, %v2557_v32 }
 0x448   :  { %v2621_v60 = vsel %vm916_vm1, %v2620_v35, %v2616_v4  ;;  %2963 = vmatpush3.bf16.msra.mxu1 %v2692_v17  ;;  %2964 = vmatprep.mubr.msk.bf16.mxu1 %vm3102_vm11, %v3101_v26 }
 0x449   :  { %v2622_v52 = vpack.c.b16 %v2621_v60, %v2621_v60  ;;  %v2674_v24 = vpop.permute.xlu1 %2673  ;;  %v2677_v63 = vpop.permute.xlu0 %2676 }
 0x44a   :  { %v2681_v22 = vrot.slane %v2674_v24, %v3132_v8  ;;  %v2685_v37 = vrot.slane %v2677_v63, %v3138_v11 }
 0x44b   :  { %2959 = vmatmul.mubr.msk.bf16.vlgmr.msra.gmra.mxu0 %vm1076_vm9, %v2622_v52 }
 0x44c   :  { %v2686_v41 = vsel %vm916_vm1, %v2685_v37, %v2681_v22 }
 0x44d   :  { %v2687_v33 = vpack.c.b16 %v2686_v41, %v2686_v41 }
 0x44f   :  { %2965 = vmatmul.mubr.msk.bf16.vlgmr.msra.gmra.mxu1 %vm1076_vm9, %v2687_v33 }
 0x495   :  { %v1753_v3 = vpop.f32.mrf.mxu0 }
 0x497   :  { %v2876_v36 = vpop.f32.mrf.mxu0 }
 0x499   :  { %v1756_v0 = vpop.f32.mrf.mxu0  ;;  %v1818_v42 = vpop.f32.mrf.mxu1 }
 0x49a   :  { %v2750_v30 = vrot.slane %v1818_v42, 7 }
 0x49b   :  { %v2877_v43 = vpop.f32.mrf.mxu0  ;;  %v2882_v26 = vpop.f32.mrf.mxu1 }
 0x49c   :  { %v2751_v31 = vsel %vm1053_vm2, %v2750_v30, %v1753_v3 }
 0x49d   :  { %v1821_v19 = vpop.f32.mrf.mxu1  ;;  %v1883_v27 = vpop.f32.mrf.mxu0 }
 0x49e   :  { %v2752_v38 = vrot.slane %v1883_v27, 6 }
 0x49f   :  { %v2883_v14 = vpop.f32.mrf.mxu1  ;;  %v2888_v29 = vpop.f32.mrf.mxu0 }
 0x4a0   :  { %v2753_v48 = vsel %vm1055_vm3, %v2752_v38, %v2751_v31 }
 0x4a1   :  { %v1886_v8 = vpop.f32.mrf.mxu0  ;;  %v1948_v59 = vpop.f32.mrf.mxu1 }
 0x4a2   :  { %v2754_v28 = vrot.slane %v1948_v59, 5 }
 0x4a3   :  { %v2889_v11 = vpop.f32.mrf.mxu0  ;;  %v2894_v58 = vpop.f32.mrf.mxu1 }
 0x4a4   :  { %v2755_v54 = vsel %vm1057_vm4, %v2754_v28, %v2753_v48 }
 0x4a5   :  { %v1951_v45 = vpop.f32.mrf.mxu1  ;;  %v2013_v47 = vpop.f32.mrf.mxu0 }
 0x4a6   :  { %v2756_v13 = vrot.slane %v2013_v47, 4 }
 0x4a7   :  { %v2895_v23 = vpop.f32.mrf.mxu1  ;;  %v2900_v5 = vpop.f32.mrf.mxu0 }
 0x4a8   :  { %v2757_v12 = vsel %vm1059_vm5, %v2756_v13, %v2755_v54 }
 0x4a9   :  { %v2016_v40 = vpop.f32.mrf.mxu0  ;;  %v2078_v62 = vpop.f32.mrf.mxu1 }
 0x4aa   :  { %v2758_v9 = vrot.slane %v2078_v62, 3 }
 0x4ab   :  { %v2901_v46 = vpop.f32.mrf.mxu0  ;;  %v2906_v7 = vpop.f32.mrf.mxu1 }
 0x4ac   :  { %v2759_v21 = vsel %vm1061_vm6, %v2758_v9, %v2757_v12 }
 0x4ad   :  { %v2081_v49 = vpop.f32.mrf.mxu1  ;;  %v2143_v51 = vpop.f32.mrf.mxu0 }
 0x4ae   :  { %v2760_v16 = vrot.slane %v2143_v51, 2 }
 0x4af   :  { %v2907_v44 = vpop.f32.mrf.mxu1  ;;  %v2912_v53 = vpop.f32.mrf.mxu0 }
 0x4b0   :  { %v2761_v6 = vsel %vm1063_vm7, %v2760_v16, %v2759_v21 }
 0x4b1   :  { %v2146_v20 = vpop.f32.mrf.mxu0  ;;  %v2208_v56 = vpop.f32.mrf.mxu1 }
 0x4b2   :  { %v2762_v55 = vrot.slane %v2208_v56, 1 }
 0x4b3   :  { %v2913_v18 = vpop.f32.mrf.mxu0  ;;  %v2918_v15 = vpop.f32.mrf.mxu1 }
 0x4b4   :  { %v2763_v25 = vsel %vm1065_vm8, %v2762_v55, %v2761_v6 }
 0x4b5   :  { %2780 = vst [vmem:[#allocation2] sm:$0xff] %v2763_v25  ;;  %v2211_v10 = vpop.f32.mrf.mxu1 }
 0x4b7   :  { %v2919_v61 = vpop.f32.mrf.mxu1 }
 0x4f3   :  { %v2273_v57 = vpop.f32.mrf.mxu0 }
 0x4f5   :  { %v2924_v50 = vpop.f32.mrf.mxu0 }
 0x4f7   :  { %v2276_v39 = vpop.f32.mrf.mxu0  ;;  %v2338_v32 = vpop.f32.mrf.mxu1 }
 0x4f8   :  { %v2764_v0 = vrot.slane %v2338_v32, 7 }
 0x4f9   :  { %v2925_v1 = vpop.f32.mrf.mxu0  ;;  %v2930_v34 = vpop.f32.mrf.mxu1 }
 0x4fa   :  { %v2765_v8 = vsel %vm1053_vm2, %v2764_v0, %v2273_v57 }
 0x4fb   :  { %v2341_v2 = vpop.f32.mrf.mxu1  ;;  %v2403_v17 = vpop.f32.mrf.mxu0 }
 0x4fc   :  { %v2766_v42 = vrot.slane %v2403_v17, 6 }
 0x4fd   :  { %v2931_v4 = vpop.f32.mrf.mxu1  ;;  %v2936_v35 = vpop.f32.mrf.mxu0 }
 0x4fe   :  { %v2767_v11 = vsel %vm1055_vm3, %v2766_v42, %v2765_v8 }
 0x4ff   :  { %v2406_v60 = vpop.f32.mrf.mxu0  ;;  %v2468_v52 = vpop.f32.mrf.mxu1 }
 0x500   :  { %v2768_v19 = vrot.slane %v2468_v52, 5 }
 0x501   :  { %v2937_v24 = vpop.f32.mrf.mxu0  ;;  %v2942_v63 = vpop.f32.mrf.mxu1 }
 0x502   :  { %v2769_v23 = vsel %vm1057_vm4, %v2768_v19, %v2767_v11 }
 0x503   :  { %v2471_v22 = vpop.f32.mrf.mxu1  ;;  %v2533_v37 = vpop.f32.mrf.mxu0 }
 0x504   :  { %v2770_v27 = vrot.slane %v2533_v37, 4 }
 0x505   :  { %v2943_v41 = vpop.f32.mrf.mxu1  ;;  %v2948_v33 = vpop.f32.mrf.mxu0 }
 0x506   :  { %v2771_v5 = vsel %vm1059_vm5, %v2770_v27, %v2769_v23 }
 0x507   :  { %v2536_v3 = vpop.f32.mrf.mxu0  ;;  %v2598_v36 = vpop.f32.mrf.mxu1 }
 0x508   :  { %v2772_v59 = vrot.slane %v2598_v36, 3 }
 0x509   :  { %v2949_v43 = vpop.f32.mrf.mxu0  ;;  %v2954_v26 = vpop.f32.mrf.mxu1 }
 0x50a   :  { %v2773_v30 = vsel %vm1061_vm6, %v2772_v59, %v2771_v5 }
 0x50b   :  { %v2601_v14 = vpop.f32.mrf.mxu1  ;;  %v2663_v29 = vpop.f32.mrf.mxu0 }
 0x50c   :  { %v2774_v58 = vrot.slane %v2663_v29, 2 }
 0x50d   :  { %v2955_v45 = vpop.f32.mrf.mxu1  ;;  %v2960_v47 = vpop.f32.mrf.mxu0 }
 0x50e   :  { %v2775_v46 = vsel %vm1063_vm7, %v2774_v58, %v2773_v30 }
 0x50f   :  { %v2666_v40 = vpop.f32.mrf.mxu0  ;;  %v2728_v62 = vpop.f32.mrf.mxu1 }
 0x510   :  { %v2776_v38 = vrot.slane %v2728_v62, 1 }
 0x511   :  { %v2961_v7 = vpop.f32.mrf.mxu0  ;;  %v2966_v28 = vpop.f32.mrf.mxu1 }
 0x512   :  { %v2777_v13 = vsel %vm1065_vm8, %v2776_v38, %v2775_v46 }
 0x513   :  { %2781 = vst [vmem:[#allocation2 + $0x8] sm:$0xff] %v2777_v13  ;;  %v2731_v49 = vpop.f32.mrf.mxu1 }
 0x514   :  { %3088 = shalt.err (!%p3085_p4)
}
 0x515   :  { %s3104_s28 = smov 128   ;;  %s3105_s29 = smov 8   ;;  %v2967_v51 = vpop.f32.mrf.mxu1 }
 0x516   :  { %2793 = dma.vmem_to_hbm [thread:$0]  %s2788_s26, 256, %s3953_s3, [#allocation3], %s3104_s28, %s3104_s28, %s3105_s29  }
 0x517   :  { %3097 = dma.done.wait [#allocation3], 256  }
 0x518   :  { %3098 = vsyncadd [#allocation3], 4294967040 }
 0x519   :  { %2797 = vsyncpa [#allocation3], 1 }

</bundles_post_ra>
